<compile_context>
chip_gen: v7x
topology: tpu7x:2x2x1
jax: 0.10.0
libtpu: 0.0.40
codegen_flags: <defaults>
</compile_context>

<pallas_src>
import jax
import jax.numpy as jnp
from jax.experimental import pallas as pl
from jax.experimental.pallas import tpu as pltpu


# ----------------------------------------------------------------------------
# In-kernel building blocks (trace-time helpers)
# ----------------------------------------------------------------------------

def _linear(x, w_ref, b_ref, relu=False):
    """y = x @ w + b (optional ReLU). BN scale folded into w; w is bf16, acc f32."""
    y = jnp.dot(x.astype(jnp.bfloat16), w_ref[...],
                preferred_element_type=jnp.float32) + b_ref[...]
    return jnp.maximum(y, 0.0) if relu else y


def _dw_conv3x3(x, b_tile, gflat_ref, w_ref, b_ref):
    """Depthwise 3x3 conv on a flattened (b_tile*Min, C) activation.

    gflat_ref: (Mout, 9*Min) one-hot gather matrix (zero padding + stride baked
               in), shared across the batch tile.
    w_ref:     (9, C) depthwise weights (BN scale folded), applied per-tap on
               the VPU before the matmul.
    b_ref:     (1, C) bias.
    One fat-K MXU matmul per sample:  G @ [x*w_k stacked over taps] -> (Mout, C).
    """
    rows, c = x.shape
    m_in = rows // b_tile
    g = gflat_ref[...]                              # (Mout, 9*Min) bf16 one-hot
    w9 = w_ref[...][:, None, :]                     # (9, 1, C) f32, hoisted
    outs = []
    for b in range(b_tile):                         # static, small
        xb = x[b * m_in:(b + 1) * m_in, :]          # (Min, C) f32, static slice
        xs = (w9 * xb[None, :, :]).reshape(9 * m_in, c).astype(jnp.bfloat16)
        outs.append(jnp.dot(g, xs, preferred_element_type=jnp.float32))
    y = outs[0] if b_tile == 1 else jnp.concatenate(outs, axis=0)
    return y + b_ref[...]


def _squeeze_excite(x, b_tile, w1_ref, b1_ref, w2_ref, b2_ref):
    """SE: per-sample global mean -> FC/ReLU -> FC/sigmoid -> channel gate."""
    rows, c = x.shape
    spatial = rows // b_tile
    x3 = x.reshape(b_tile, spatial, c)
    pooled = jnp.mean(x3, axis=1)                                   # (b_tile, C)
    s = jnp.maximum(
        jnp.dot(pooled.astype(jnp.bfloat16), w1_ref[...],
                preferred_element_type=jnp.float32) + b1_ref[...], 0.0)
    gate = jax.nn.sigmoid(
        jnp.dot(s.astype(jnp.bfloat16), w2_ref[...],
                preferred_element_type=jnp.float32) + b2_ref[...])   # (b_tile, C)
    return (x3 * gate[:, None, :]).reshape(rows, c)


def _mnv3_kernel(
    patches_ref, g1_ref, g2_ref, g3_ref,
    stem_w_ref, stem_b_ref,
    b1_dw_w_ref, b1_dw_b_ref, b1_se_w1_ref, b1_se_b1_ref, b1_se_w2_ref, b1_se_b2_ref,
    b1_pw_w_ref, b1_pw_b_ref,
    b2_exp_w_ref, b2_exp_b_ref, b2_dw_w_ref, b2_dw_b_ref, b2_proj_w_ref, b2_proj_b_ref,
    b3_exp_w_ref, b3_exp_b_ref, b3_dw_w_ref, b3_dw_b_ref,
    b3_se_w1_ref, b3_se_b1_ref, b3_se_w2_ref, b3_se_b2_ref,
    b3_proj_w_ref, b3_proj_b_ref,
    head_w_ref, head_b_ref, cls_w_ref, cls_b_ref,
    out_ref,
):
    bt, sp0, kk = patches_ref.shape                  # (B_TILE, 64, 32)
    patches = patches_ref[...].reshape(bt * sp0, kk)

    # stem: conv 3x3 s2 as one batched matmul on pre-extracted patches + BN + ReLU
    x = _linear(patches, stem_w_ref, stem_b_ref, relu=True)          # (bt*64, 16)

    # block 1: DepthwiseSeparable (dw s1 -> SE -> pw) + skip
    sc = x
    d = jnp.maximum(_dw_conv3x3(x, bt, g1_ref, b1_dw_w_ref, b1_dw_b_ref), 0.0)
    d = _squeeze_excite(d, bt, b1_se_w1_ref, b1_se_b1_ref, b1_se_w2_ref, b1_se_b2_ref)
    x = _linear(d, b1_pw_w_ref, b1_pw_b_ref) + sc                     # (bt*64, 16)

    # block 2: InvertedResidual (pw expand -> dw s2 -> pw project), no skip
    e = _linear(x, b2_exp_w_ref, b2_exp_b_ref, relu=True)             # (bt*64, 32)
    d = jnp.maximum(_dw_conv3x3(e, bt, g2_ref, b2_dw_w_ref, b2_dw_b_ref), 0.0)
    x = _linear(d, b2_proj_w_ref, b2_proj_b_ref)                      # (bt*16, 24)

    # block 3: InvertedResidual (pw expand -> dw s1 -> SE -> pw project) + skip
    sc = x
    e = _linear(x, b3_exp_w_ref, b3_exp_b_ref, relu=True)             # (bt*16, 48)
    d = jnp.maximum(_dw_conv3x3(e, bt, g3_ref, b3_dw_w_ref, b3_dw_b_ref), 0.0)
    d = _squeeze_excite(d, bt, b3_se_w1_ref, b3_se_b1_ref, b3_se_w2_ref, b3_se_b2_ref)
    x = _linear(d, b3_proj_w_ref, b3_proj_b_ref) + sc                 # (bt*16, 24)

    # head: per-sample global avg pool -> conv_head(1x1)+bias -> ReLU -> classifier
    # drop_rate = 0.0 -> dropout is identity.
    rows, c = x.shape
    pooled = jnp.mean(x.reshape(bt, rows // bt, c), axis=1)           # (bt, 24)
    h = _linear(pooled, head_w_ref, head_b_ref, relu=True)            # (bt, 64)
    logits = _linear(h, cls_w_ref, cls_b_ref)                         # (bt, 128) lane-dense
    out_ref[0] = logits.astype(out_ref.dtype)


# ----------------------------------------------------------------------------
# Wrapper-side preparation (input im2col, gather matrices, BN folding)
# ----------------------------------------------------------------------------

def extract_patches(x, ksize, stride, pad):
    """x: (N, H, W, C) NHWC -> (N, Ho, Wo, ksize*ksize, C) conv taps (plain JAX)."""
    N, H, W, C = x.shape
    xp = jnp.pad(x, ((0, 0), (pad, pad), (pad, pad), (0, 0)))
    Ho = (H + 2 * pad - ksize) // stride + 1
    Wo = (W + 2 * pad - ksize) // stride + 1
    taps = []
    for kh in range(ksize):
        for kw in range(ksize):
            taps.append(xp[:, kh:kh + stride * Ho:stride, kw:kw + stride * Wo:stride, :])
    return jnp.stack(taps, axis=3)


def _make_dw_gather_flat(H, W, stride):
    """(Ho*Wo, 9*H*W) flattened one-hot gather matrix for a 3x3 conv, pad=1, bf16."""
    Ho = (H + 2 - 3) // stride + 1
    Wo = (W + 2 - 3) // stride + 1
    j = jnp.arange(Ho * Wo)
    oh, ow = j // Wo, j % Wo
    cols = jnp.arange(H * W)[None, :]
    mats = []
    for kh in (-1, 0, 1):
        for kw in (-1, 0, 1):
            ih = oh * stride + kh
            iw = ow * stride + kw
            valid = (ih >= 0) & (ih < H) & (iw >= 0) & (iw < W)
            src = jnp.where(valid, ih * W + iw, -1)        # -1 never matches a column
            mats.append(((src[:, None] == cols) & valid[:, None]).astype(jnp.float32))
    g = jnp.stack(mats, axis=0)                            # (9, Mout, Min)
    nine, mo, mi = g.shape
    # flatten to (Mout, 9*Min):  gflat[m, k*Min + i] = g[k, m, i]
    return jnp.transpose(g, (1, 0, 2)).reshape(mo, nine * mi).astype(jnp.bfloat16)


def _fold_bn(w, scale):
    """Fold eval-mode BN scale into conv weights (scale is per output channel)."""
    return (w * scale[None, :]).astype(jnp.float32)


def _kernel_operands(p, stem_k_pad, padded_classes):
    """Weights/biases in kernel-argument order (BN folded, bf16 MXU operands)."""
    def b2d(v):                       # biases stay f32 for the VPU epilogue
        return v.reshape(1, -1).astype(jnp.float32)

    def mxu(w):                       # static MXU operands -> bf16
        return w.astype(jnp.bfloat16)

    stem_w = _fold_bn(p["stem_w"], p["stem_scale"])
    stem_w = jnp.pad(stem_w, ((0, stem_k_pad - stem_w.shape[0]), (0, 0)))
    ops = [mxu(stem_w), b2d(p["stem_bias"])]

    b = p["b1"]
    ops += [_fold_bn(b["dw_w"], b["dw_scale"]), b2d(b["dw_bias"]),    # dw weights stay f32 (VPU)
            mxu(b["se_w1"]), b2d(b["se_b1"]), mxu(b["se_w2"]), b2d(b["se_b2"]),
            mxu(_fold_bn(b["pw_w"], b["pw_scale"])), b2d(b["pw_bias"])]
    b = p["b2"]
    ops += [mxu(_fold_bn(b["exp_w"], b["exp_scale"])), b2d(b["exp_bias"]),
            _fold_bn(b["dw_w"], b["dw_scale"]), b2d(b["dw_bias"]),
            mxu(_fold_bn(b["proj_w"], b["proj_scale"])), b2d(b["proj_bias"])]
    b = p["b3"]
    ops += [mxu(_fold_bn(b["exp_w"], b["exp_scale"])), b2d(b["exp_bias"]),
            _fold_bn(b["dw_w"], b["dw_scale"]), b2d(b["dw_bias"]),
            mxu(b["se_w1"]), b2d(b["se_b1"]), mxu(b["se_w2"]), b2d(b["se_b2"]),
            mxu(_fold_bn(b["proj_w"], b["proj_scale"])), b2d(b["proj_bias"])]

    nc = p["cls_w"].shape[1]
    cls_w = jnp.pad(p["cls_w"], ((0, 0), (0, padded_classes - nc)))
    cls_b = jnp.pad(p["cls_b"], (0, padded_classes - nc))
    ops += [mxu(p["head_w"]), b2d(p["head_b"]), mxu(cls_w), b2d(cls_b)]
    return ops


def mobilenetv3_forward(x_nchw, params, b_tile=None):
    """PyTorch-style NCHW input -> (N, num_classes) logits; one fused pallas_call."""
    x = jnp.transpose(x_nchw, (0, 2, 3, 1)).astype(jnp.float32)                 # NHWC
    N, H, W, _ = x.shape
    Ho, Wo = H // 2, W // 2

    # im2col of the *network input* only (few KB/sample); all downstream
    # activations stay inside the fused kernel.
    p = extract_patches(x, ksize=3, stride=2, pad=1)                            # (N, 8, 8, 9, 3)
    patches = p.reshape(N, Ho * Wo, -1)                                         # (N, 64, 27)
    k_stem = patches.shape[-1]
    stem_k_pad = ((k_stem + 7) // 8) * 8                                        # 27 -> 32

    # Batch tile: fold B_TILE samples into the matmul M dimension per grid step,
    # keeping >= 2 grid steps so both v7x TensorCores get work.
    if b_tile is None:
        b_tile = 1 if N <= 2 else max(1, min(8, N // 2))
    grid_len = -(-N // b_tile)
    n_pad = grid_len * b_tile

    patches = jnp.pad(patches, ((0, n_pad - N), (0, 0), (0, stem_k_pad - k_stem)))
    patches = patches.astype(jnp.bfloat16)                                      # bf16 MXU operand

    g1 = _make_dw_gather_flat(Ho, Wo, 1)              # block 1 dw:           (64, 576)
    g2 = _make_dw_gather_flat(Ho, Wo, 2)              # block 2 dw, stride 2: (16, 576)
    g3 = _make_dw_gather_flat(Ho // 2, Wo // 2, 1)    # block 3 dw:           (16, 144)

    num_classes = params["cls_w"].shape[1]
    padded_classes = max(128, ((num_classes + 127) // 128) * 128)               # lane-dense out

    operands = [patches, g1, g2, g3] + _kernel_operands(params, stem_k_pad, padded_classes)

    in_specs = [pl.BlockSpec((b_tile,) + patches.shape[1:], lambda n: (n, 0, 0))]
    for a in operands[1:]:
        in_specs.append(pl.BlockSpec(a.shape, lambda n, nd=a.ndim: (0,) * nd))
    # TODO(synk): constant-index weight/gather operands could use
    # pipeline_mode=pl.Buffered(1) to halve their (tiny) resident VMEM; left at
    # the default double-buffering for portability.

    # Advisory cost estimate so XLA schedules the surrounding im2col correctly.
    sp0, sp1 = Ho * Wo, (Ho // 2) * (Wo // 2)
    mm = [(sp0, stem_k_pad, 16), (sp0, 9 * sp0, 16), (1, 16, 4), (1, 4, 16), (sp0, 16, 16),
          (sp0, 16, 32), (sp1, 9 * sp0, 32), (sp1, 32, 24),
          (sp1, 24, 48), (sp1, 9 * sp1, 48), (1, 48, 12), (1, 12, 48), (sp1, 48, 24),
          (1, 24, 64), (1, 64, padded_classes)]
    flops = 2 * n_pad * sum(m * k * c for m, k, c in mm)
    bytes_accessed = (sum(int(a.size) * a.dtype.itemsize for a in operands)
                      + n_pad * padded_classes * 4)
    cost = pl.CostEstimate(flops=int(flops), transcendentals=int(n_pad * 64),
                           bytes_accessed=int(bytes_accessed))

    out = pl.pallas_call(
        _mnv3_kernel,
        out_shape=jax.ShapeDtypeStruct((grid_len, b_tile, padded_classes), jnp.float32),
        grid=(grid_len,),
        in_specs=in_specs,
        out_specs=pl.BlockSpec((1, b_tile, padded_classes), lambda n: (n, 0, 0)),
        compiler_params=pltpu.CompilerParams(dimension_semantics=("parallel",)),
        cost_estimate=cost,
    )(*operands)
    return out.reshape(n_pad, padded_classes)[:N, :num_classes]


# ----------------------------------------------------------------------------
# Pure-JAX reference (for self-validation only; not on the hot path)
# ----------------------------------------------------------------------------

def _reference_forward(x_nchw, p):
    x = jnp.transpose(x_nchw, (0, 2, 3, 1)).astype(jnp.float32)

    def conv(x, w, stride, groups=1):
        return jax.lax.conv_general_dilated(
            x, w, (stride, stride), [(1, 1), (1, 1)],
            dimension_numbers=("NHWC", "HWIO", "NHWC"), feature_group_count=groups)

    def pw(x, w):
        return jnp.einsum("nhwc,cd->nhwd", x, w)

    def se(x, w1, b1, w2, b2):
        pooled = jnp.mean(x, axis=(1, 2), keepdims=True)
        s = jax.nn.relu(pw(pooled, w1) + b1)
        return x * jax.nn.sigmoid(pw(s, w2) + b2)

    x = jax.nn.relu(conv(x, p["stem_w"].reshape(3, 3, 3, -1), 2) * p["stem_scale"]
                    + p["stem_bias"])

    b = p["b1"]; sc = x; C = x.shape[-1]
    x = jax.nn.relu(conv(x, b["dw_w"].reshape(3, 3, 1, C), 1, groups=C) * b["dw_scale"]
                    + b["dw_bias"])
    x = se(x, b["se_w1"], b["se_b1"], b["se_w2"], b["se_b2"])
    x = pw(x, b["pw_w"]) * b["pw_scale"] + b["pw_bias"] + sc

    b = p["b2"]
    x = jax.nn.relu(pw(x, b["exp_w"]) * b["exp_scale"] + b["exp_bias"])
    C = x.shape[-1]
    x = jax.nn.relu(conv(x, b["dw_w"].reshape(3, 3, 1, C), 2, groups=C) * b["dw_scale"]
                    + b["dw_bias"])
    x = pw(x, b["proj_w"]) * b["proj_scale"] + b["proj_bias"]

    b = p["b3"]; sc = x
    x = jax.nn.relu(pw(x, b["exp_w"]) * b["exp_scale"] + b["exp_bias"])
    C = x.shape[-1]
    x = jax.nn.relu(conv(x, b["dw_w"].reshape(3, 3, 1, C), 1, groups=C) * b["dw_scale"]
                    + b["dw_bias"])
    x = se(x, b["se_w1"], b["se_b1"], b["se_w2"], b["se_b2"])
    x = pw(x, b["proj_w"]) * b["proj_scale"] + b["proj_bias"] + sc

    pooled = jnp.mean(x, axis=(1, 2))
    h = jax.nn.relu(pooled @ p["head_w"] + p["head_b"])
    return h @ p["cls_w"] + p["cls_b"]


# ----------------------------------------------------------------------------
# Deterministic parameter init (BN kept as scale/bias; folded in the wrapper)
# ----------------------------------------------------------------------------

def _bn_fold(gamma, beta, mean, var, eps=1e-5):
    scale = gamma / jnp.sqrt(var + eps)
    bias = beta - mean * scale
    return scale, bias


def _make_bn(key, c):
    k1, k2, k3 = jax.random.split(key, 3)
    gamma = 1.0 + 0.1 * jax.random.normal(k1, (c,), jnp.float32)
    beta = 0.1 * jax.random.normal(k2, (c,), jnp.float32)
    mean = 0.1 * jax.random.normal(k3, (c,), jnp.float32)
    var = jnp.full((c,), 0.9, jnp.float32)
    return _bn_fold(gamma, beta, mean, var)


def _kaiming(key, shape, fan_in):
    return jax.random.normal(key, shape, jnp.float32) * jnp.sqrt(2.0 / fan_in)


def init_params(key):
    keys = iter(jax.random.split(key, 64))
    p = {}

    cin, cstem = 3, 16
    p["stem_w"] = _kaiming(next(keys), (3 * 3 * cin, cstem), 3 * 3 * cin)
    p["stem_scale"], p["stem_bias"] = _make_bn(next(keys), cstem)

    # block1: DepthwiseSeparable 16->16, SE reduce 4
    c, rd = 16, 4
    b = {}
    b["dw_w"] = _kaiming(next(keys), (9, c), 9)
    b["dw_scale"], b["dw_bias"] = _make_bn(next(keys), c)
    b["se_w1"] = _kaiming(next(keys), (c, rd), c)
    b["se_b1"] = jnp.zeros((rd,), jnp.float32)
    b["se_w2"] = _kaiming(next(keys), (rd, c), rd)
    b["se_b2"] = jnp.zeros((c,), jnp.float32)
    b["pw_w"] = _kaiming(next(keys), (c, c), c)
    b["pw_scale"], b["pw_bias"] = _make_bn(next(keys), c)
    p["b1"] = b

    # block2: InvertedResidual 16 -> exp 32 -> dw s2 -> 24
    cin2, cmid2, cout2 = 16, 32, 24
    b = {}
    b["exp_w"] = _kaiming(next(keys), (cin2, cmid2), cin2)
    b["exp_scale"], b["exp_bias"] = _make_bn(next(keys), cmid2)
    b["dw_w"] = _kaiming(next(keys), (9, cmid2), 9)
    b["dw_scale"], b["dw_bias"] = _make_bn(next(keys), cmid2)
    b["proj_w"] = _kaiming(next(keys), (cmid2, cout2), cmid2)
    b["proj_scale"], b["proj_bias"] = _make_bn(next(keys), cout2)
    p["b2"] = b

    # block3: InvertedResidual 24 -> exp 48 -> dw s1 -> SE reduce 12 -> 24, skip
    cin3, cmid3, cout3, rd3 = 24, 48, 24, 12
    b = {}
    b["exp_w"] = _kaiming(next(keys), (cin3, cmid3), cin3)
    b["exp_scale"], b["exp_bias"] = _make_bn(next(keys), cmid3)
    b["dw_w"] = _kaiming(next(keys), (9, cmid3), 9)
    b["dw_scale"], b["dw_bias"] = _make_bn(next(keys), cmid3)
    b["se_w1"] = _kaiming(next(keys), (cmid3, rd3), cmid3)
    b["se_b1"] = jnp.zeros((rd3,), jnp.float32)
    b["se_w2"] = _kaiming(next(keys), (rd3, cmid3), rd3)
    b["se_b2"] = jnp.zeros((cmid3,), jnp.float32)
    b["proj_w"] = _kaiming(next(keys), (cmid3, cout3), cmid3)
    b["proj_scale"], b["proj_bias"] = _make_bn(next(keys), cout3)
    p["b3"] = b

    # head: 24 -> 64 (conv_head, bias) -> ReLU; classifier 64 -> 10
    num_features, num_classes = 64, 10
    p["head_w"] = _kaiming(next(keys), (cout3, num_features), cout3)
    p["head_b"] = 0.01 * jax.random.normal(next(keys), (num_features,), jnp.float32)
    p["cls_w"] = 0.01 * jax.random.normal(next(keys), (num_features, num_classes), jnp.float32)
    p["cls_b"] = jnp.zeros((num_classes,), jnp.float32)
    return p


# TODO(synk): dropout / drop-path / BN training-mode batch statistics are not
# exercised (drop_rate=0, drop_path_rate=0, BN folded in eval mode).

if __name__ == "__main__":
    key = jax.random.PRNGKey(0)
    x = jax.random.normal(key, (2, 3, 16, 16), jnp.float32)  # NCHW, like PyTorch
    params = init_params(jax.random.PRNGKey(1))

    fwd = jax.jit(mobilenetv3_forward)
    logits = fwd(x, params)
    jax.block_until_ready(logits)

    assert logits.shape == (2, 10), logits.shape
    assert bool(jnp.all(jnp.isfinite(logits)))

    # Loose-tolerance sanity check against a pure-JAX f32 reference (the kernel
    # uses bf16 MXU operands with f32 accumulation and a different conv
    # decomposition).
    ref = _reference_forward(x, params)
    max_diff = float(jnp.max(jnp.abs(logits - ref)))
    assert max_diff < 5e-2, f"kernel/reference mismatch: {max_diff}"

    print("KERNEL_OK")
</pallas_src>

<mosaic_0001>
module attributes {stable_mosaic.version = 11 : i64} {
  func.func @_mnv3_kernel(%arg0: i32, %arg1: memref<1x64x32xbf16, #tpu.memory_space<vmem>>, %arg2: memref<64x576xbf16, #tpu.memory_space<vmem>>, %arg3: memref<16x576xbf16, #tpu.memory_space<vmem>>, %arg4: memref<16x144xbf16, #tpu.memory_space<vmem>>, %arg5: memref<32x16xbf16, #tpu.memory_space<vmem>>, %arg6: memref<1x16xf32, #tpu.memory_space<vmem>>, %arg7: memref<9x16xf32, #tpu.memory_space<vmem>>, %arg8: memref<1x16xf32, #tpu.memory_space<vmem>>, %arg9: memref<16x4xbf16, #tpu.memory_space<vmem>>, %arg10: memref<1x4xf32, #tpu.memory_space<vmem>>, %arg11: memref<4x16xbf16, #tpu.memory_space<vmem>>, %arg12: memref<1x16xf32, #tpu.memory_space<vmem>>, %arg13: memref<16x16xbf16, #tpu.memory_space<vmem>>, %arg14: memref<1x16xf32, #tpu.memory_space<vmem>>, %arg15: memref<16x32xbf16, #tpu.memory_space<vmem>>, %arg16: memref<1x32xf32, #tpu.memory_space<vmem>>, %arg17: memref<9x32xf32, #tpu.memory_space<vmem>>, %arg18: memref<1x32xf32, #tpu.memory_space<vmem>>, %arg19: memref<32x24xbf16, #tpu.memory_space<vmem>>, %arg20: memref<1x24xf32, #tpu.memory_space<vmem>>, %arg21: memref<24x48xbf16, #tpu.memory_space<vmem>>, %arg22: memref<1x48xf32, #tpu.memory_space<vmem>>, %arg23: memref<9x48xf32, #tpu.memory_space<vmem>>, %arg24: memref<1x48xf32, #tpu.memory_space<vmem>>, %arg25: memref<48x12xbf16, #tpu.memory_space<vmem>>, %arg26: memref<1x12xf32, #tpu.memory_space<vmem>>, %arg27: memref<12x48xbf16, #tpu.memory_space<vmem>>, %arg28: memref<1x48xf32, #tpu.memory_space<vmem>>, %arg29: memref<48x24xbf16, #tpu.memory_space<vmem>>, %arg30: memref<1x24xf32, #tpu.memory_space<vmem>>, %arg31: memref<24x64xbf16, #tpu.memory_space<vmem>>, %arg32: memref<1x64xf32, #tpu.memory_space<vmem>>, %arg33: memref<64x128xbf16, #tpu.memory_space<vmem>>, %arg34: memref<1x128xf32, #tpu.memory_space<vmem>>, %arg35: memref<1x1x128xf32, #tpu.memory_space<vmem>>) attributes {dimension_semantics = [#tpu.dimension_semantics<parallel>], iteration_bounds = array<i64: 2>, scalar_prefetch = 0 : i64, scratch_operands = 0 : i64, tpu.core_type = #tpu.core_type<tc>, window_params = [{transform_indices = @transform_0, window_bounds = array<i64: 1, 64, 32>}, {pipeline_mode = #tpu.pipeline_mode<synchronous>, transform_indices = @transform_1, window_bounds = array<i64: 64, 576>}, {pipeline_mode = #tpu.pipeline_mode<synchronous>, transform_indices = @transform_2, window_bounds = array<i64: 16, 576>}, {pipeline_mode = #tpu.pipeline_mode<synchronous>, transform_indices = @transform_3, window_bounds = array<i64: 16, 144>}, {pipeline_mode = #tpu.pipeline_mode<synchronous>, transform_indices = @transform_4, window_bounds = array<i64: 32, 16>}, {pipeline_mode = #tpu.pipeline_mode<synchronous>, transform_indices = @transform_5, window_bounds = array<i64: 1, 16>}, {pipeline_mode = #tpu.pipeline_mode<synchronous>, transform_indices = @transform_6, window_bounds = array<i64: 9, 16>}, {pipeline_mode = #tpu.pipeline_mode<synchronous>, transform_indices = @transform_7, window_bounds = array<i64: 1, 16>}, {pipeline_mode = #tpu.pipeline_mode<synchronous>, transform_indices = @transform_8, window_bounds = array<i64: 16, 4>}, {pipeline_mode = #tpu.pipeline_mode<synchronous>, transform_indices = @transform_9, window_bounds = array<i64: 1, 4>}, {pipeline_mode = #tpu.pipeline_mode<synchronous>, transform_indices = @transform_10, window_bounds = array<i64: 4, 16>}, {pipeline_mode = #tpu.pipeline_mode<synchronous>, transform_indices = @transform_11, window_bounds = array<i64: 1, 16>}, {pipeline_mode = #tpu.pipeline_mode<synchronous>, transform_indices = @transform_12, window_bounds = array<i64: 16, 16>}, {pipeline_mode = #tpu.pipeline_mode<synchronous>, transform_indices = @transform_13, window_bounds = array<i64: 1, 16>}, {pipeline_mode = #tpu.pipeline_mode<synchronous>, transform_indices = @transform_14, window_bounds = array<i64: 16, 32>}, {pipeline_mode = #tpu.pipeline_mode<synchronous>, transform_indices = @transform_15, window_bounds = array<i64: 1, 32>}, {pipeline_mode = #tpu.pipeline_mode<synchronous>, transform_indices = @transform_16, window_bounds = array<i64: 9, 32>}, {pipeline_mode = #tpu.pipeline_mode<synchronous>, transform_indices = @transform_17, window_bounds = array<i64: 1, 32>}, {pipeline_mode = #tpu.pipeline_mode<synchronous>, transform_indices = @transform_18, window_bounds = array<i64: 32, 24>}, {pipeline_mode = #tpu.pipeline_mode<synchronous>, transform_indices = @transform_19, window_bounds = array<i64: 1, 24>}, {pipeline_mode = #tpu.pipeline_mode<synchronous>, transform_indices = @transform_20, window_bounds = array<i64: 24, 48>}, {pipeline_mode = #tpu.pipeline_mode<synchronous>, transform_indices = @transform_21, window_bounds = array<i64: 1, 48>}, {pipeline_mode = #tpu.pipeline_mode<synchronous>, transform_indices = @transform_22, window_bounds = array<i64: 9, 48>}, {pipeline_mode = #tpu.pipeline_mode<synchronous>, transform_indices = @transform_23, window_bounds = array<i64: 1, 48>}, {pipeline_mode = #tpu.pipeline_mode<synchronous>, transform_indices = @transform_24, window_bounds = array<i64: 48, 12>}, {pipeline_mode = #tpu.pipeline_mode<synchronous>, transform_indices = @transform_25, window_bounds = array<i64: 1, 12>}, {pipeline_mode = #tpu.pipeline_mode<synchronous>, transform_indices = @transform_26, window_bounds = array<i64: 12, 48>}, {pipeline_mode = #tpu.pipeline_mode<synchronous>, transform_indices = @transform_27, window_bounds = array<i64: 1, 48>}, {pipeline_mode = #tpu.pipeline_mode<synchronous>, transform_indices = @transform_28, window_bounds = array<i64: 48, 24>}, {pipeline_mode = #tpu.pipeline_mode<synchronous>, transform_indices = @transform_29, window_bounds = array<i64: 1, 24>}, {pipeline_mode = #tpu.pipeline_mode<synchronous>, transform_indices = @transform_30, window_bounds = array<i64: 24, 64>}, {pipeline_mode = #tpu.pipeline_mode<synchronous>, transform_indices = @transform_31, window_bounds = array<i64: 1, 64>}, {pipeline_mode = #tpu.pipeline_mode<synchronous>, transform_indices = @transform_32, window_bounds = array<i64: 64, 128>}, {pipeline_mode = #tpu.pipeline_mode<synchronous>, transform_indices = @transform_33, window_bounds = array<i64: 1, 128>}, {transform_indices = @transform_34, window_bounds = array<i64: 1, 1, 128>}]} {
    %c0 = arith.constant 0 : index
    %c0_0 = arith.constant 0 : index
    %c0_1 = arith.constant 0 : index
    %0 = vector.load %arg1[%c0, %c0_0, %c0_1] : memref<1x64x32xbf16, #tpu.memory_space<vmem>>, vector<1x64x32xbf16>
    %1 = vector.shape_cast %0 : vector<1x64x32xbf16> to vector<64x32xbf16>
    %c0_2 = arith.constant 0 : index
    %c0_3 = arith.constant 0 : index
    %2 = vector.load %arg5[%c0_2, %c0_3] : memref<32x16xbf16, #tpu.memory_space<vmem>>, vector<32x16xbf16>
    %cst = arith.constant dense<0.000000e+00> : vector<64x16xf32>
    %3 = tpu.matmul %1, %2, %cst {dimension_numbers = #tpu.dot_dimension_numbers<[1], [0], [0], [1], [0, 0, 1, 1], [], []>} : vector<64x32xbf16>, vector<32x16xbf16>, vector<64x16xf32> -> vector<64x16xf32>
    %c0_4 = arith.constant 0 : index
    %c0_5 = arith.constant 0 : index
    %4 = vector.load %arg6[%c0_4, %c0_5] : memref<1x16xf32, #tpu.memory_space<vmem>>, vector<1x16xf32>
    %5 = vector.broadcast %4 : vector<1x16xf32> to vector<64x16xf32>
    %6 = arith.addf %3, %5 : vector<64x16xf32>
    %cst_6 = arith.constant 0.000000e+00 : f32
    %7 = vector.broadcast %cst_6 : f32 to vector<64x16xf32>
    %8 = arith.maximumf %6, %7 : vector<64x16xf32>
    %c0_7 = arith.constant 0 : index
    %c0_8 = arith.constant 0 : index
    %9 = vector.load %arg2[%c0_7, %c0_8] : memref<64x576xbf16, #tpu.memory_space<vmem>>, vector<64x576xbf16>
    %c0_9 = arith.constant 0 : index
    %c0_10 = arith.constant 0 : index
    %10 = vector.load %arg7[%c0_9, %c0_10] : memref<9x16xf32, #tpu.memory_space<vmem>>, vector<9x16xf32>
    %11 = vector.shape_cast %10 : vector<9x16xf32> to vector<9x1x16xf32>
    %12 = vector.shape_cast %8 : vector<64x16xf32> to vector<1x64x16xf32>
    %13 = vector.broadcast %11 : vector<9x1x16xf32> to vector<9x64x16xf32>
    %14 = vector.broadcast %12 : vector<1x64x16xf32> to vector<9x64x16xf32>
    %15 = arith.mulf %13, %14 : vector<9x64x16xf32>
    %16 = vector.shape_cast %15 : vector<9x64x16xf32> to vector<576x16xf32>
    %17 = arith.truncf %16 : vector<576x16xf32> to vector<576x16xbf16>
    %cst_11 = arith.constant dense<0.000000e+00> : vector<64x16xf32>
    %18 = tpu.matmul %9, %17, %cst_11 {dimension_numbers = #tpu.dot_dimension_numbers<[1], [0], [0], [1], [0, 0, 1, 1], [], []>} : vector<64x576xbf16>, vector<576x16xbf16>, vector<64x16xf32> -> vector<64x16xf32>
    %c0_12 = arith.constant 0 : index
    %c0_13 = arith.constant 0 : index
    %19 = vector.load %arg8[%c0_12, %c0_13] : memref<1x16xf32, #tpu.memory_space<vmem>>, vector<1x16xf32>
    %20 = vector.broadcast %19 : vector<1x16xf32> to vector<64x16xf32>
    %21 = arith.addf %18, %20 : vector<64x16xf32>
    %cst_14 = arith.constant 0.000000e+00 : f32
    %22 = vector.broadcast %cst_14 : f32 to vector<64x16xf32>
    %23 = arith.maximumf %21, %22 : vector<64x16xf32>
    %24 = vector.shape_cast %23 : vector<64x16xf32> to vector<1x64x16xf32>
    %cst_15 = arith.constant dense<0.000000e+00> : vector<1x16xf32>
    %25 = vector.multi_reduction <add>, %24, %cst_15 [1] : vector<1x64x16xf32> to vector<1x16xf32>
    %cst_16 = arith.constant 6.400000e+01 : f32
    %26 = vector.broadcast %cst_16 : f32 to vector<1x16xf32>
    %27 = arith.divf %25, %26 : vector<1x16xf32>
    %28 = arith.truncf %27 : vector<1x16xf32> to vector<1x16xbf16>
    %c0_17 = arith.constant 0 : index
    %c0_18 = arith.constant 0 : index
    %29 = vector.load %arg9[%c0_17, %c0_18] : memref<16x4xbf16, #tpu.memory_space<vmem>>, vector<16x4xbf16>
    %cst_19 = arith.constant dense<0.000000e+00> : vector<1x4xf32>
    %30 = tpu.matmul %28, %29, %cst_19 {dimension_numbers = #tpu.dot_dimension_numbers<[1], [0], [0], [1], [0, 0, 1, 1], [], []>} : vector<1x16xbf16>, vector<16x4xbf16>, vector<1x4xf32> -> vector<1x4xf32>
    %c0_20 = arith.constant 0 : index
    %c0_21 = arith.constant 0 : index
    %31 = vector.load %arg10[%c0_20, %c0_21] : memref<1x4xf32, #tpu.memory_space<vmem>>, vector<1x4xf32>
    %32 = arith.addf %30, %31 : vector<1x4xf32>
    %cst_22 = arith.constant 0.000000e+00 : f32
    %33 = vector.broadcast %cst_22 : f32 to vector<1x4xf32>
    %34 = arith.maximumf %32, %33 : vector<1x4xf32>
    %35 = arith.truncf %34 : vector<1x4xf32> to vector<1x4xbf16>
    %c0_23 = arith.constant 0 : index
    %c0_24 = arith.constant 0 : index
    %36 = vector.load %arg11[%c0_23, %c0_24] : memref<4x16xbf16, #tpu.memory_space<vmem>>, vector<4x16xbf16>
    %cst_25 = arith.constant dense<0.000000e+00> : vector<1x16xf32>
    %37 = tpu.matmul %35, %36, %cst_25 {dimension_numbers = #tpu.dot_dimension_numbers<[1], [0], [0], [1], [0, 0, 1, 1], [], []>} : vector<1x4xbf16>, vector<4x16xbf16>, vector<1x16xf32> -> vector<1x16xf32>
    %c0_26 = arith.constant 0 : index
    %c0_27 = arith.constant 0 : index
    %38 = vector.load %arg12[%c0_26, %c0_27] : memref<1x16xf32, #tpu.memory_space<vmem>>, vector<1x16xf32>
    %39 = arith.addf %37, %38 : vector<1x16xf32>
    %40 = arith.negf %39 : vector<1x16xf32>
    %41 = math.exp %40 : vector<1x16xf32>
    %cst_28 = arith.constant 1.000000e+00 : f32
    %42 = vector.broadcast %cst_28 : f32 to vector<1x16xf32>
    %43 = arith.addf %42, %41 : vector<1x16xf32>
    %44 = arith.divf %42, %43 : vector<1x16xf32>
    %45 = vector.shape_cast %44 : vector<1x16xf32> to vector<1x1x16xf32>
    %46 = vector.broadcast %45 : vector<1x1x16xf32> to vector<1x64x16xf32>
    %47 = arith.mulf %24, %46 : vector<1x64x16xf32>
    %48 = vector.shape_cast %47 : vector<1x64x16xf32> to vector<64x16xf32>
    %49 = arith.truncf %48 : vector<64x16xf32> to vector<64x16xbf16>
    %c0_29 = arith.constant 0 : index
    %c0_30 = arith.constant 0 : index
    %50 = vector.load %arg13[%c0_29, %c0_30] : memref<16x16xbf16, #tpu.memory_space<vmem>>, vector<16x16xbf16>
    %cst_31 = arith.constant dense<0.000000e+00> : vector<64x16xf32>
    %51 = tpu.matmul %49, %50, %cst_31 {dimension_numbers = #tpu.dot_dimension_numbers<[1], [0], [0], [1], [0, 0, 1, 1], [], []>} : vector<64x16xbf16>, vector<16x16xbf16>, vector<64x16xf32> -> vector<64x16xf32>
    %c0_32 = arith.constant 0 : index
    %c0_33 = arith.constant 0 : index
    %52 = vector.load %arg14[%c0_32, %c0_33] : memref<1x16xf32, #tpu.memory_space<vmem>>, vector<1x16xf32>
    %53 = vector.broadcast %52 : vector<1x16xf32> to vector<64x16xf32>
    %54 = arith.addf %51, %53 : vector<64x16xf32>
    %55 = arith.addf %54, %8 : vector<64x16xf32>
    %56 = arith.truncf %55 : vector<64x16xf32> to vector<64x16xbf16>
    %c0_34 = arith.constant 0 : index
    %c0_35 = arith.constant 0 : index
    %57 = vector.load %arg15[%c0_34, %c0_35] : memref<16x32xbf16, #tpu.memory_space<vmem>>, vector<16x32xbf16>
    %cst_36 = arith.constant dense<0.000000e+00> : vector<64x32xf32>
    %58 = tpu.matmul %56, %57, %cst_36 {dimension_numbers = #tpu.dot_dimension_numbers<[1], [0], [0], [1], [0, 0, 1, 1], [], []>} : vector<64x16xbf16>, vector<16x32xbf16>, vector<64x32xf32> -> vector<64x32xf32>
    %c0_37 = arith.constant 0 : index
    %c0_38 = arith.constant 0 : index
    %59 = vector.load %arg16[%c0_37, %c0_38] : memref<1x32xf32, #tpu.memory_space<vmem>>, vector<1x32xf32>
    %60 = vector.broadcast %59 : vector<1x32xf32> to vector<64x32xf32>
    %61 = arith.addf %58, %60 : vector<64x32xf32>
    %cst_39 = arith.constant 0.000000e+00 : f32
    %62 = vector.broadcast %cst_39 : f32 to vector<64x32xf32>
    %63 = arith.maximumf %61, %62 : vector<64x32xf32>
    %c0_40 = arith.constant 0 : index
    %c0_41 = arith.constant 0 : index
    %64 = vector.load %arg3[%c0_40, %c0_41] : memref<16x576xbf16, #tpu.memory_space<vmem>>, vector<16x576xbf16>
    %c0_42 = arith.constant 0 : index
    %c0_43 = arith.constant 0 : index
    %65 = vector.load %arg17[%c0_42, %c0_43] : memref<9x32xf32, #tpu.memory_space<vmem>>, vector<9x32xf32>
    %66 = vector.shape_cast %65 : vector<9x32xf32> to vector<9x1x32xf32>
    %67 = vector.shape_cast %63 : vector<64x32xf32> to vector<1x64x32xf32>
    %68 = vector.broadcast %66 : vector<9x1x32xf32> to vector<9x64x32xf32>
    %69 = vector.broadcast %67 : vector<1x64x32xf32> to vector<9x64x32xf32>
    %70 = arith.mulf %68, %69 : vector<9x64x32xf32>
    %71 = vector.shape_cast %70 : vector<9x64x32xf32> to vector<576x32xf32>
    %72 = arith.truncf %71 : vector<576x32xf32> to vector<576x32xbf16>
    %cst_44 = arith.constant dense<0.000000e+00> : vector<16x32xf32>
    %73 = tpu.matmul %64, %72, %cst_44 {dimension_numbers = #tpu.dot_dimension_numbers<[1], [0], [0], [1], [0, 0, 1, 1], [], []>} : vector<16x576xbf16>, vector<576x32xbf16>, vector<16x32xf32> -> vector<16x32xf32>
    %c0_45 = arith.constant 0 : index
    %c0_46 = arith.constant 0 : index
    %74 = vector.load %arg18[%c0_45, %c0_46] : memref<1x32xf32, #tpu.memory_space<vmem>>, vector<1x32xf32>
    %75 = vector.broadcast %74 : vector<1x32xf32> to vector<16x32xf32>
    %76 = arith.addf %73, %75 : vector<16x32xf32>
    %cst_47 = arith.constant 0.000000e+00 : f32
    %77 = vector.broadcast %cst_47 : f32 to vector<16x32xf32>
    %78 = arith.maximumf %76, %77 : vector<16x32xf32>
    %79 = arith.truncf %78 : vector<16x32xf32> to vector<16x32xbf16>
    %c0_48 = arith.constant 0 : index
    %c0_49 = arith.constant 0 : index
    %80 = vector.load %arg19[%c0_48, %c0_49] : memref<32x24xbf16, #tpu.memory_space<vmem>>, vector<32x24xbf16>
    %cst_50 = arith.constant dense<0.000000e+00> : vector<16x24xf32>
    %81 = tpu.matmul %79, %80, %cst_50 {dimension_numbers = #tpu.dot_dimension_numbers<[1], [0], [0], [1], [0, 0, 1, 1], [], []>} : vector<16x32xbf16>, vector<32x24xbf16>, vector<16x24xf32> -> vector<16x24xf32>
    %c0_51 = arith.constant 0 : index
    %c0_52 = arith.constant 0 : index
    %82 = vector.load %arg20[%c0_51, %c0_52] : memref<1x24xf32, #tpu.memory_space<vmem>>, vector<1x24xf32>
    %83 = vector.broadcast %82 : vector<1x24xf32> to vector<16x24xf32>
    %84 = arith.addf %81, %83 : vector<16x24xf32>
    %85 = arith.truncf %84 : vector<16x24xf32> to vector<16x24xbf16>
    %c0_53 = arith.constant 0 : index
    %c0_54 = arith.constant 0 : index
    %86 = vector.load %arg21[%c0_53, %c0_54] : memref<24x48xbf16, #tpu.memory_space<vmem>>, vector<24x48xbf16>
    %cst_55 = arith.constant dense<0.000000e+00> : vector<16x48xf32>
    %87 = tpu.matmul %85, %86, %cst_55 {dimension_numbers = #tpu.dot_dimension_numbers<[1], [0], [0], [1], [0, 0, 1, 1], [], []>} : vector<16x24xbf16>, vector<24x48xbf16>, vector<16x48xf32> -> vector<16x48xf32>
    %c0_56 = arith.constant 0 : index
    %c0_57 = arith.constant 0 : index
    %88 = vector.load %arg22[%c0_56, %c0_57] : memref<1x48xf32, #tpu.memory_space<vmem>>, vector<1x48xf32>
    %89 = vector.broadcast %88 : vector<1x48xf32> to vector<16x48xf32>
    %90 = arith.addf %87, %89 : vector<16x48xf32>
    %cst_58 = arith.constant 0.000000e+00 : f32
    %91 = vector.broadcast %cst_58 : f32 to vector<16x48xf32>
    %92 = arith.maximumf %90, %91 : vector<16x48xf32>
    %c0_59 = arith.constant 0 : index
    %c0_60 = arith.constant 0 : index
    %93 = vector.load %arg4[%c0_59, %c0_60] : memref<16x144xbf16, #tpu.memory_space<vmem>>, vector<16x144xbf16>
    %c0_61 = arith.constant 0 : index
    %c0_62 = arith.constant 0 : index
    %94 = vector.load %arg23[%c0_61, %c0_62] : memref<9x48xf32, #tpu.memory_space<vmem>>, vector<9x48xf32>
    %95 = vector.shape_cast %94 : vector<9x48xf32> to vector<9x1x48xf32>
    %96 = vector.shape_cast %92 : vector<16x48xf32> to vector<1x16x48xf32>
    %97 = vector.broadcast %95 : vector<9x1x48xf32> to vector<9x16x48xf32>
    %98 = vector.broadcast %96 : vector<1x16x48xf32> to vector<9x16x48xf32>
    %99 = arith.mulf %97, %98 : vector<9x16x48xf32>
    %100 = vector.shape_cast %99 : vector<9x16x48xf32> to vector<144x48xf32>
    %101 = arith.truncf %100 : vector<144x48xf32> to vector<144x48xbf16>
    %cst_63 = arith.constant dense<0.000000e+00> : vector<16x48xf32>
    %102 = tpu.matmul %93, %101, %cst_63 {dimension_numbers = #tpu.dot_dimension_numbers<[1], [0], [0], [1], [0, 0, 1, 1], [], []>} : vector<16x144xbf16>, vector<144x48xbf16>, vector<16x48xf32> -> vector<16x48xf32>
    %c0_64 = arith.constant 0 : index
    %c0_65 = arith.constant 0 : index
    %103 = vector.load %arg24[%c0_64, %c0_65] : memref<1x48xf32, #tpu.memory_space<vmem>>, vector<1x48xf32>
    %104 = vector.broadcast %103 : vector<1x48xf32> to vector<16x48xf32>
    %105 = arith.addf %102, %104 : vector<16x48xf32>
    %cst_66 = arith.constant 0.000000e+00 : f32
    %106 = vector.broadcast %cst_66 : f32 to vector<16x48xf32>
    %107 = arith.maximumf %105, %106 : vector<16x48xf32>
    %108 = vector.shape_cast %107 : vector<16x48xf32> to vector<1x16x48xf32>
    %cst_67 = arith.constant dense<0.000000e+00> : vector<1x48xf32>
    %109 = vector.multi_reduction <add>, %108, %cst_67 [1] : vector<1x16x48xf32> to vector<1x48xf32>
    %cst_68 = arith.constant 1.600000e+01 : f32
    %110 = vector.broadcast %cst_68 : f32 to vector<1x48xf32>
    %111 = arith.divf %109, %110 : vector<1x48xf32>
    %112 = arith.truncf %111 : vector<1x48xf32> to vector<1x48xbf16>
    %c0_69 = arith.constant 0 : index
    %c0_70 = arith.constant 0 : index
    %113 = vector.load %arg25[%c0_69, %c0_70] : memref<48x12xbf16, #tpu.memory_space<vmem>>, vector<48x12xbf16>
    %cst_71 = arith.constant dense<0.000000e+00> : vector<1x12xf32>
    %114 = tpu.matmul %112, %113, %cst_71 {dimension_numbers = #tpu.dot_dimension_numbers<[1], [0], [0], [1], [0, 0, 1, 1], [], []>} : vector<1x48xbf16>, vector<48x12xbf16>, vector<1x12xf32> -> vector<1x12xf32>
    %c0_72 = arith.constant 0 : index
    %c0_73 = arith.constant 0 : index
    %115 = vector.load %arg26[%c0_72, %c0_73] : memref<1x12xf32, #tpu.memory_space<vmem>>, vector<1x12xf32>
    %116 = arith.addf %114, %115 : vector<1x12xf32>
    %cst_74 = arith.constant 0.000000e+00 : f32
    %117 = vector.broadcast %cst_74 : f32 to vector<1x12xf32>
    %118 = arith.maximumf %116, %117 : vector<1x12xf32>
    %119 = arith.truncf %118 : vector<1x12xf32> to vector<1x12xbf16>
    %c0_75 = arith.constant 0 : index
    %c0_76 = arith.constant 0 : index
    %120 = vector.load %arg27[%c0_75, %c0_76] : memref<12x48xbf16, #tpu.memory_space<vmem>>, vector<12x48xbf16>
    %cst_77 = arith.constant dense<0.000000e+00> : vector<1x48xf32>
    %121 = tpu.matmul %119, %120, %cst_77 {dimension_numbers = #tpu.dot_dimension_numbers<[1], [0], [0], [1], [0, 0, 1, 1], [], []>} : vector<1x12xbf16>, vector<12x48xbf16>, vector<1x48xf32> -> vector<1x48xf32>
    %c0_78 = arith.constant 0 : index
    %c0_79 = arith.constant 0 : index
    %122 = vector.load %arg28[%c0_78, %c0_79] : memref<1x48xf32, #tpu.memory_space<vmem>>, vector<1x48xf32>
    %123 = arith.addf %121, %122 : vector<1x48xf32>
    %124 = arith.negf %123 : vector<1x48xf32>
    %125 = math.exp %124 : vector<1x48xf32>
    %cst_80 = arith.constant 1.000000e+00 : f32
    %126 = vector.broadcast %cst_80 : f32 to vector<1x48xf32>
    %127 = arith.addf %126, %125 : vector<1x48xf32>
    %128 = arith.divf %126, %127 : vector<1x48xf32>
    %129 = vector.shape_cast %128 : vector<1x48xf32> to vector<1x1x48xf32>
    %130 = vector.broadcast %129 : vector<1x1x48xf32> to vector<1x16x48xf32>
    %131 = arith.mulf %108, %130 : vector<1x16x48xf32>
    %132 = vector.shape_cast %131 : vector<1x16x48xf32> to vector<16x48xf32>
    %133 = arith.truncf %132 : vector<16x48xf32> to vector<16x48xbf16>
    %c0_81 = arith.constant 0 : index
    %c0_82 = arith.constant 0 : index
    %134 = vector.load %arg29[%c0_81, %c0_82] : memref<48x24xbf16, #tpu.memory_space<vmem>>, vector<48x24xbf16>
    %cst_83 = arith.constant dense<0.000000e+00> : vector<16x24xf32>
    %135 = tpu.matmul %133, %134, %cst_83 {dimension_numbers = #tpu.dot_dimension_numbers<[1], [0], [0], [1], [0, 0, 1, 1], [], []>} : vector<16x48xbf16>, vector<48x24xbf16>, vector<16x24xf32> -> vector<16x24xf32>
    %c0_84 = arith.constant 0 : index
    %c0_85 = arith.constant 0 : index
    %136 = vector.load %arg30[%c0_84, %c0_85] : memref<1x24xf32, #tpu.memory_space<vmem>>, vector<1x24xf32>
    %137 = vector.broadcast %136 : vector<1x24xf32> to vector<16x24xf32>
    %138 = arith.addf %135, %137 : vector<16x24xf32>
    %139 = arith.addf %138, %84 : vector<16x24xf32>
    %140 = vector.shape_cast %139 : vector<16x24xf32> to vector<1x16x24xf32>
    %cst_86 = arith.constant dense<0.000000e+00> : vector<1x24xf32>
    %141 = vector.multi_reduction <add>, %140, %cst_86 [1] : vector<1x16x24xf32> to vector<1x24xf32>
    %cst_87 = arith.constant 1.600000e+01 : f32
    %142 = vector.broadcast %cst_87 : f32 to vector<1x24xf32>
    %143 = arith.divf %141, %142 : vector<1x24xf32>
    %144 = arith.truncf %143 : vector<1x24xf32> to vector<1x24xbf16>
    %c0_88 = arith.constant 0 : index
    %c0_89 = arith.constant 0 : index
    %145 = vector.load %arg31[%c0_88, %c0_89] : memref<24x64xbf16, #tpu.memory_space<vmem>>, vector<24x64xbf16>
    %cst_90 = arith.constant dense<0.000000e+00> : vector<1x64xf32>
    %146 = tpu.matmul %144, %145, %cst_90 {dimension_numbers = #tpu.dot_dimension_numbers<[1], [0], [0], [1], [0, 0, 1, 1], [], []>} : vector<1x24xbf16>, vector<24x64xbf16>, vector<1x64xf32> -> vector<1x64xf32>
    %c0_91 = arith.constant 0 : index
    %c0_92 = arith.constant 0 : index
    %147 = vector.load %arg32[%c0_91, %c0_92] : memref<1x64xf32, #tpu.memory_space<vmem>>, vector<1x64xf32>
    %148 = arith.addf %146, %147 : vector<1x64xf32>
    %cst_93 = arith.constant 0.000000e+00 : f32
    %149 = vector.broadcast %cst_93 : f32 to vector<1x64xf32>
    %150 = arith.maximumf %148, %149 : vector<1x64xf32>
    %151 = arith.truncf %150 : vector<1x64xf32> to vector<1x64xbf16>
    %c0_94 = arith.constant 0 : index
    %c0_95 = arith.constant 0 : index
    %152 = vector.load %arg33[%c0_94, %c0_95] : memref<64x128xbf16, #tpu.memory_space<vmem>>, vector<64x128xbf16>
    %cst_96 = arith.constant dense<0.000000e+00> : vector<1x128xf32>
    %153 = tpu.matmul %151, %152, %cst_96 {dimension_numbers = #tpu.dot_dimension_numbers<[1], [0], [0], [1], [0, 0, 1, 1], [], []>} : vector<1x64xbf16>, vector<64x128xbf16>, vector<1x128xf32> -> vector<1x128xf32>
    %c0_97 = arith.constant 0 : index
    %c0_98 = arith.constant 0 : index
    %154 = vector.load %arg34[%c0_97, %c0_98] : memref<1x128xf32, #tpu.memory_space<vmem>>, vector<1x128xf32>
    %155 = arith.addf %153, %154 : vector<1x128xf32>
    %c0_99 = arith.constant 0 : index
    %c0_100 = arith.constant 0 : index
    %c0_101 = arith.constant 0 : index
    %156 = vector.load %arg35[%c0_99, %c0_100, %c0_101] : memref<1x1x128xf32, #tpu.memory_space<vmem>>, vector<1x1x128xf32>
    %157 = vector.shape_cast %156 : vector<1x1x128xf32> to vector<1x128xf32>
    %158 = vector.shape_cast %155 : vector<1x128xf32> to vector<1x1x128xf32>
    tpu.vector_store %arg35[%c0_99, %c0_100, %c0_101], %158 {strides = array<i32>} : memref<1x1x128xf32, #tpu.memory_space<vmem>>, vector<1x1x128xf32>,
    return
  }
  func.func @transform_0(%arg0: i32) -> (i32, i32, i32) {
    %c0_i32 = arith.constant 0 : i32
    %c0_i32_0 = arith.constant 0 : i32
    %c0_i32_1 = arith.constant 0 : i32
    return %arg0, %c0_i32, %c0_i32_0 : i32, i32, i32
  }
  func.func @transform_1(%arg0: i32) -> (i32, i32) {
    %c0_i32 = arith.constant 0 : i32
    %c0_i32_0 = arith.constant 0 : i32
    %c0_i32_1 = arith.constant 0 : i32
    return %c0_i32, %c0_i32_0 : i32, i32
  }
  func.func @transform_2(%arg0: i32) -> (i32, i32) {
    %c0_i32 = arith.constant 0 : i32
    %c0_i32_0 = arith.constant 0 : i32
    %c0_i32_1 = arith.constant 0 : i32
    return %c0_i32, %c0_i32_0 : i32, i32
  }
  func.func @transform_3(%arg0: i32) -> (i32, i32) {
    %c0_i32 = arith.constant 0 : i32
    %c0_i32_0 = arith.constant 0 : i32
    %c0_i32_1 = arith.constant 0 : i32
    return %c0_i32, %c0_i32_0 : i32, i32
  }
  func.func @transform_4(%arg0: i32) -> (i32, i32) {
    %c0_i32 = arith.constant 0 : i32
    %c0_i32_0 = arith.constant 0 : i32
    %c0_i32_1 = arith.constant 0 : i32
    return %c0_i32, %c0_i32_0 : i32, i32
  }
  func.func @transform_5(%arg0: i32) -> (i32, i32) {
    %c0_i32 = arith.constant 0 : i32
    %c0_i32_0 = arith.constant 0 : i32
    %c0_i32_1 = arith.constant 0 : i32
    return %c0_i32, %c0_i32_0 : i32, i32
  }
  func.func @transform_6(%arg0: i32) -> (i32, i32) {
    %c0_i32 = arith.constant 0 : i32
    %c0_i32_0 = arith.constant 0 : i32
    %c0_i32_1 = arith.constant 0 : i32
    return %c0_i32, %c0_i32_0 : i32, i32
  }
  func.func @transform_7(%arg0: i32) -> (i32, i32) {
    %c0_i32 = arith.constant 0 : i32
    %c0_i32_0 = arith.constant 0 : i32
    %c0_i32_1 = arith.constant 0 : i32
    return %c0_i32, %c0_i32_0 : i32, i32
  }
  func.func @transform_8(%arg0: i32) -> (i32, i32) {
    %c0_i32 = arith.constant 0 : i32
    %c0_i32_0 = arith.constant 0 : i32
    %c0_i32_1 = arith.constant 0 : i32
    return %c0_i32, %c0_i32_0 : i32, i32
  }
  func.func @transform_9(%arg0: i32) -> (i32, i32) {
    %c0_i32 = arith.constant 0 : i32
    %c0_i32_0 = arith.constant 0 : i32
    %c0_i32_1 = arith.constant 0 : i32
    return %c0_i32, %c0_i32_0 : i32, i32
  }
  func.func @transform_10(%arg0: i32) -> (i32, i32) {
    %c0_i32 = arith.constant 0 : i32
    %c0_i32_0 = arith.constant 0 : i32
    %c0_i32_1 = arith.constant 0 : i32
    return %c0_i32, %c0_i32_0 : i32, i32
  }
  func.func @transform_11(%arg0: i32) -> (i32, i32) {
    %c0_i32 = arith.constant 0 : i32
    %c0_i32_0 = arith.constant 0 : i32
    %c0_i32_1 = arith.constant 0 : i32
    return %c0_i32, %c0_i32_0 : i32, i32
  }
  func.func @transform_12(%arg0: i32) -> (i32, i32) {
    %c0_i32 = arith.constant 0 : i32
    %c0_i32_0 = arith.constant 0 : i32
    %c0_i32_1 = arith.constant 0 : i32
    return %c0_i32, %c0_i32_0 : i32, i32
  }
  func.func @transform_13(%arg0: i32) -> (i32, i32) {
    %c0_i32 = arith.constant 0 : i32
    %c0_i32_0 = arith.constant 0 : i32
    %c0_i32_1 = arith.constant 0 : i32
    return %c0_i32, %c0_i32_0 : i32, i32
  }
  func.func @transform_14(%arg0: i32) -> (i32, i32) {
    %c0_i32 = arith.constant 0 : i32
    %c0_i32_0 = arith.constant 0 : i32
    %c0_i32_1 = arith.constant 0 : i32
    return %c0_i32, %c0_i32_0 : i32, i32
  }
  func.func @transform_15(%arg0: i32) -> (i32, i32) {
    %c0_i32 = arith.constant 0 : i32
    %c0_i32_0 = arith.constant 0 : i32
    %c0_i32_1 = arith.constant 0 : i32
    return %c0_i32, %c0_i32_0 : i32, i32
  }
  func.func @transform_16(%arg0: i32) -> (i32, i32) {
    %c0_i32 = arith.constant 0 : i32
    %c0_i32_0 = arith.constant 0 : i32
    %c0_i32_1 = arith.constant 0 : i32
    return %c0_i32, %c0_i32_0 : i32, i32
  }
  func.func @transform_17(%arg0: i32) -> (i32, i32) {
    %c0_i32 = arith.constant 0 : i32
    %c0_i32_0 = arith.constant 0 : i32
    %c0_i32_1 = arith.constant 0 : i32
    return %c0_i32, %c0_i32_0 : i32, i32
  }
  func.func @transform_18(%arg0: i32) -> (i32, i32) {
    %c0_i32 = arith.constant 0 : i32
    %c0_i32_0 = arith.constant 0 : i32
    %c0_i32_1 = arith.constant 0 : i32
    return %c0_i32, %c0_i32_0 : i32, i32
  }
  func.func @transform_19(%arg0: i32) -> (i32, i32) {
    %c0_i32 = arith.constant 0 : i32
    %c0_i32_0 = arith.constant 0 : i32
    %c0_i32_1 = arith.constant 0 : i32
    return %c0_i32, %c0_i32_0 : i32, i32
  }
  func.func @transform_20(%arg0: i32) -> (i32, i32) {
    %c0_i32 = arith.constant 0 : i32
    %c0_i32_0 = arith.constant 0 : i32
    %c0_i32_1 = arith.constant 0 : i32
    return %c0_i32, %c0_i32_0 : i32, i32
  }
  func.func @transform_21(%arg0: i32) -> (i32, i32) {
    %c0_i32 = arith.constant 0 : i32
    %c0_i32_0 = arith.constant 0 : i32
    %c0_i32_1 = arith.constant 0 : i32
    return %c0_i32, %c0_i32_0 : i32, i32
  }
  func.func @transform_22(%arg0: i32) -> (i32, i32) {
    %c0_i32 = arith.constant 0 : i32
    %c0_i32_0 = arith.constant 0 : i32
    %c0_i32_1 = arith.constant 0 : i32
    return %c0_i32, %c0_i32_0 : i32, i32
  }
  func.func @transform_23(%arg0: i32) -> (i32, i32) {
    %c0_i32 = arith.constant 0 : i32
    %c0_i32_0 = arith.constant 0 : i32
    %c0_i32_1 = arith.constant 0 : i32
    return %c0_i32, %c0_i32_0 : i32, i32
  }
  func.func @transform_24(%arg0: i32) -> (i32, i32) {
    %c0_i32 = arith.constant 0 : i32
    %c0_i32_0 = arith.constant 0 : i32
    %c0_i32_1 = arith.constant 0 : i32
    return %c0_i32, %c0_i32_0 : i32, i32
  }
  func.func @transform_25(%arg0: i32) -> (i32, i32) {
    %c0_i32 = arith.constant 0 : i32
    %c0_i32_0 = arith.constant 0 : i32
    %c0_i32_1 = arith.constant 0 : i32
    return %c0_i32, %c0_i32_0 : i32, i32
  }
  func.func @transform_26(%arg0: i32) -> (i32, i32) {
    %c0_i32 = arith.constant 0 : i32
    %c0_i32_0 = arith.constant 0 : i32
    %c0_i32_1 = arith.constant 0 : i32
    return %c0_i32, %c0_i32_0 : i32, i32
  }
  func.func @transform_27(%arg0: i32) -> (i32, i32) {
    %c0_i32 = arith.constant 0 : i32
    %c0_i32_0 = arith.constant 0 : i32
    %c0_i32_1 = arith.constant 0 : i32
    return %c0_i32, %c0_i32_0 : i32, i32
  }
  func.func @transform_28(%arg0: i32) -> (i32, i32) {
    %c0_i32 = arith.constant 0 : i32
    %c0_i32_0 = arith.constant 0 : i32
    %c0_i32_1 = arith.constant 0 : i32
    return %c0_i32, %c0_i32_0 : i32, i32
  }
  func.func @transform_29(%arg0: i32) -> (i32, i32) {
    %c0_i32 = arith.constant 0 : i32
    %c0_i32_0 = arith.constant 0 : i32
    %c0_i32_1 = arith.constant 0 : i32
    return %c0_i32, %c0_i32_0 : i32, i32
  }
  func.func @transform_30(%arg0: i32) -> (i32, i32) {
    %c0_i32 = arith.constant 0 : i32
    %c0_i32_0 = arith.constant 0 : i32
    %c0_i32_1 = arith.constant 0 : i32
    return %c0_i32, %c0_i32_0 : i32, i32
  }
  func.func @transform_31(%arg0: i32) -> (i32, i32) {
    %c0_i32 = arith.constant 0 : i32
    %c0_i32_0 = arith.constant 0 : i32
    %c0_i32_1 = arith.constant 0 : i32
    return %c0_i32, %c0_i32_0 : i32, i32
  }
  func.func @transform_32(%arg0: i32) -> (i32, i32) {
    %c0_i32 = arith.constant 0 : i32
    %c0_i32_0 = arith.constant 0 : i32
    %c0_i32_1 = arith.constant 0 : i32
    return %c0_i32, %c0_i32_0 : i32, i32
  }
  func.func @transform_33(%arg0: i32) -> (i32, i32) {
    %c0_i32 = arith.constant 0 : i32
    %c0_i32_0 = arith.constant 0 : i32
    %c0_i32_1 = arith.constant 0 : i32
    return %c0_i32, %c0_i32_0 : i32, i32
  }
  func.func @transform_34(%arg0: i32) -> (i32, i32, i32) {
    %c0_i32 = arith.constant 0 : i32
    %c0_i32_0 = arith.constant 0 : i32
    %c0_i32_1 = arith.constant 0 : i32
    return %arg0, %c0_i32, %c0_i32_0 : i32, i32, i32
  }
}

</mosaic_0001>

<bundles_post_ra>
// kernel: mobilenetv3_forward.1
= control target key start
LH: loop header
LB: loop body
LE: loop exit
PB: predicated region body
PF: predicated region fallthrough
CT: control target
= control target key end

     0   :  { %s3943_s6 = smov 1   ;;  %s3944_s10 = smov 2   ;;  %s4883_s0 = inlined_call_operand.smem [shape: u32[35], index: -1, kind: input, shape index: {}] }
   0x1   :  { %s3990_s5 = sld [smem:[%s4883_s0]]   ;;  %s3945_s14 = smov 3  }
   0x2   :  { %s3995_s9 = sld [smem:[%s4883_s0 + %s3943_s6]]   ;;  %s3946_s18 = smov 4  }
   0x3   :  { %s4000_s13 = sld [smem:[%s4883_s0 + %s3944_s10]]   ;;  %s3947_s22 = smov 5  }
   0x4   :  { %s4005_s17 = sld [smem:[%s4883_s0 + %s3945_s14]]   ;;  %s3948_s26 = smov 6  }
   0x5   :  { %s4010_s21 = sld [smem:[%s4883_s0 + %s3946_s18]]   ;;  %s3949_s30 = smov 7  }
   0x6   :  { %s4015_s25 = sld [smem:[%s4883_s0 + %s3947_s22]]   ;;  %s3950_s4 = smov 8  }
   0x7   :  { %4899 = sst [smem:[#allocation5_spill]] %s3990_s5  ;;  %s3951_s10 = smov 9  }
   0x8   :  { %4900 = sst [smem:[#allocation6_spill]] %s3995_s9  ;;  %s3952_s15 = smov 10  }
   0x9   :  { %s4020_s29 = sld [smem:[%s4883_s0 + %s3948_s26]]   ;;  %s3953_s20 = smov 11  }
   0xa   :  { %4901 = sst [smem:[#allocation7_spill]] %s4005_s17  ;;  %s3954_s26 = smov 12  }
   0xb   :  { %s4025_s3 = sld [smem:[%s4883_s0 + %s3949_s30]]   ;;  %s3955_s1 = smov 13  }
   0xc   :  { %s4030_s8 = sld [smem:[%s4883_s0 + %s3950_s4]]   ;;  %s3956_s7 = smov 14  }
   0xd   :  { %s4035_s14 = sld [smem:[%s4883_s0 + %s3951_s10]]   ;;  %s3958_s22 = smov 16  }
   0xe   :  { %s4040_s19 = sld [smem:[%s4883_s0 + %s3952_s15]]   ;;  %s3957_s15 = smov 15  }
   0xf   :  { %s4045_s24 = sld [smem:[%s4883_s0 + %s3953_s20]]   ;;  %s3959_s28 = smov 17  }
  0x10   :  { %s4050_s30 = sld [smem:[%s4883_s0 + %s3954_s26]]  }
  0x11   :  { %4902 = sst [smem:[#allocation8_spill]] %s4025_s3 }
  0x12   :  { %4903 = sst [smem:[#allocation9_spill]] %s4030_s8 }
  0x13   :  { %s4055_s6 = sld [smem:[%s4883_s0 + %s3955_s1]]  }
  0x14   :  { %s4060_s12 = sld [smem:[%s4883_s0 + %s3956_s7]]   ;;  %s3960_s7 = smov 18  }
  0x15   :  { %s4065_s20 = sld [smem:[%s4883_s0 + %s3957_s15]]   ;;  %s3961_s15 = smov 19  }
  0x16   :  { %s4070_s27 = sld [smem:[%s4883_s0 + %s3958_s22]]   ;;  %s3962_s22 = smov 20  }
  0x17   :  { %s4075_s4 = sld [smem:[%s4883_s0 + %s3959_s28]]   ;;  %s3963_s28 = smov 21  }
  0x18   :  { %s4080_s17 = sld [smem:[%s4883_s0 + %s3960_s7]]   ;;  %s3964_s7 = smov 22  }
  0x19   :  { %4904 = sst [smem:[#allocation10_spill]] %s4055_s6 }
  0x1a   :  { %4905 = sst [smem:[#allocation11_spill]] %s4060_s12 }
  0x1b   :  { %4906 = sst [smem:[#allocation12_spill]] %s4065_s20 }
  0x1c   :  { %4907 = sst [smem:[#allocation13_spill]] %s4070_s27 }
  0x1d   :  { %4908 = sst [smem:[#allocation14_spill]] %s4075_s4 }
  0x1e   :  { %4909 = sst [smem:[#allocation15_spill]] %s4080_s17 }
  0x1f   :  { %s4085_s20 = sld [smem:[%s4883_s0 + %s3961_s15]]   ;;  %s3965_s15 = smov 23  }
  0x20   :  { %s4090_s27 = sld [smem:[%s4883_s0 + %s3962_s22]]   ;;  %s3966_s22 = smov 24  }
  0x21   :  { %s4095_s4 = sld [smem:[%s4883_s0 + %s3963_s28]]   ;;  %s3967_s28 = smov 25  }
  0x22   :  { %s4100_s17 = sld [smem:[%s4883_s0 + %s3964_s7]]   ;;  %s3968_s7 = smov 26  }
  0x25   :  { %4910 = sst [smem:[#allocation16_spill]] %s4085_s20 }
  0x26   :  { %4911 = sst [smem:[#allocation17_spill]] %s4090_s27 }
  0x27   :  { %4912 = sst [smem:[#allocation18_spill]] %s4095_s4 }
  0x28   :  { %4913 = sst [smem:[#allocation19_spill]] %s4100_s17 }
  0x29   :  { %s4105_s20 = sld [smem:[%s4883_s0 + %s3965_s15]]   ;;  %s3969_s15 = smov 27  }
  0x2a   :  { %s4110_s27 = sld [smem:[%s4883_s0 + %s3966_s22]]   ;;  %s3970_s22 = smov 28  }
  0x2b   :  { %s4115_s4 = sld [smem:[%s4883_s0 + %s3967_s28]]   ;;  %s3971_s28 = smov 29  }
  0x2c   :  { %s4120_s17 = sld [smem:[%s4883_s0 + %s3968_s7]]   ;;  %s3972_s7 = smov 30  }
  0x2f   :  { %4914 = sst [smem:[#allocation20_spill]] %s4105_s20 }
  0x30   :  { %4915 = sst [smem:[#allocation21_spill]] %s4110_s27 }
  0x31   :  { %4916 = sst [smem:[#allocation22_spill]] %s4115_s4 }
  0x32   :  { %4917 = sst [smem:[#allocation23_spill]] %s4120_s17 }
  0x33   :  { %s4125_s20 = sld [smem:[%s4883_s0 + %s3969_s15]]   ;;  %s3973_s15 = smov 31  }
  0x34   :  { %s4130_s27 = sld [smem:[%s4883_s0 + %s3970_s22]]   ;;  %s3974_s22 = smov 32  }
  0x35   :  { %s4135_s4 = sld [smem:[%s4883_s0 + %s3971_s28]]   ;;  %s3975_s28 = smov 33  }
  0x36   :  { %s4140_s17 = sld [smem:[%s4883_s0 + %s3972_s7]]   ;;  %s3976_s7 = smov 34  }
  0x39   :  { %4918 = sst [smem:[#allocation24_spill]] %s4125_s20 }
  0x3a   :  { %4919 = sst [smem:[#allocation25_spill]] %s4130_s27 }
  0x3b   :  { %4920 = sst [smem:[#allocation26_spill]] %s4135_s4 }
  0x3c   :  { %4921 = sst [smem:[#allocation27_spill]] %s4140_s17 }
  0x3d   :  { %s4145_s20 = sld [smem:[%s4883_s0 + %s3973_s15]]  }
  0x3e   :  { %s4150_s27 = sld [smem:[%s4883_s0 + %s3974_s22]]  }
  0x3f   :  { %s4155_s4 = sld [smem:[%s4883_s0 + %s3975_s28]]  }
  0x40   :  { %s4160_s17 = sld [smem:[%s4883_s0 + %s3976_s7]]  }
  0x45   :  { %4922 = sst [smem:[#allocation28_spill]] %s4155_s4 }
  0x46   :  { %74 = vsyncpa [#allocation3], 0 }
  0x47   :  { %76 = vsyncpa [#allocation3 + $0x1], 0  ;;  %s4162_s15 = smov 0   ;;  %s4164_s16 = smov 0  }
  0x48   :  { %s4166_s18 = smov 0   ;;  %s4168_s22 = smov 0  }
  0x49 LB: > { %s4923_s9 = sld [smem:[#allocation6_spill]]  ;;  %s4183_s0 = sadd.s32 4294967295, %s3941_s22   ;;  %s3929_s15 = sphi %s4162_s15, %s4949_s15   ;;  %s3941_s22 = sphi %s4168_s22, %s4952_s22   ;;  %s3937_s18 = sphi %s4166_s18, %s4951_s18   ;;  %s3933_s16 = sphi %s4164_s16, %s4950_s16  }
  0x4a   : > { %s3308_s23 = sadd.s32 4294967294, %s3941_s22   ;;  %s4187_s26 = sadd.s32 1, %s3941_s22  }
  0x4b   : > { %s808_s28 = sadd.s32 1, %s3937_s18  ;;  %s805_s1 = ssub.s32 %s3941_s22, %s4187_s26 }
  0x4c   : > { %p818_p0 = scmp.ne.s32.totalorder %s3937_s18, %s3933_s16  ;;  %p806_p1 = scmp.eq.s32.totalorder %s805_s1, 0 }
  0x4d   : > { %p819_p2 = scmp.eq.s32.totalorder %s4183_s0, 1  ;;  %p824_p3 = scmp.ne.s32.totalorder %s3933_s16, %s3929_s15 }
  0x4e   : > { %p825_p4 = scmp.eq.s32.totalorder %s3308_s23, 1  ;;  %p3311_p7 = scmp.ge.s32.totalorder %s3941_s22, 1 }
  0x4f   : > { %s4198_s2 = scalar_select %p806_p1, %s3937_s18, %s808_s28  }
  0x50   : > { %p4200_p5 = por %p819_p2, %p818_p0  ;;  %p4204_p6 = por %p825_p4, %p824_p3 }
  0x51   : > { %p950_p8 = scmp.lt.s32.totalorder %s3941_s22, 3 }
  0x53   : > { %p951_p9 = pnand %p3311_p7, %p950_p8 }
  0x54   : > { %s4926_s5 = sld [smem:[#allocation5_spill]] (!%p951_p9)  ;;  %v3804_v0 = vld [vmem:[%s4010_s21] sm:$0xff] (!%p951_p9)   ;;  %p1035_p10 = scmp.lt.s32.totalorder (!%p951_p9), %s4183_s0, 1  ;;  %v3805_v1 = vld [vmem:[%s4010_s21 + $0x8] sm:$0xff] (!%p951_p9)   ;;  %vm1092_vm0 = vcmask (!%p951_p9), 261120   ;;  %v1210_v10 = vlaneseq (!%p951_p9)  ;;  %vm1529_vm1 = vcmask (!%p951_p9), 523264  }
  0x55   : > { %954 = sbr.rel (%p951_p9) target bundleno = 3672 (0xe58), region = 156  ;;  %3593 = vmatprep.subr.bf16.mxu1 (!%p951_p9), %v3804_v0  ;;  %v3813_v6 = vld [vmem:[%s4923_s9 + $0x4] ss:$20 sps:$4 sm:$0xff] (!%p951_p9)   ;;  %v3816_v7 = vld [vmem:[%s4923_s9 + $0xc] ss:$20 sps:$4 sm:$0xff] (!%p951_p9)   ;;  %s4927_s8 = sld [smem:[#allocation9_spill]] (!%p951_p9) }
  0x56   : > { %3594 = vmatpush3.bf16.msra.mxu1 (!%p951_p9), %v3804_v0  ;;  %1639 = vmatprep.mubr.bf16.mxu0 (!%p951_p9), %v3816_v7  ;;  %v3977_v8 = vmov (!%p951_p9), 1966171168   ;;  %v1211_v12 = vshrl.u32 (!%p951_p9), %v1210_v10, 7  ;;  %v1202_v13 = vld [vmem:[%s4020_s29] sm:$0xff] (!%p951_p9)  ;;  %s4928_s3 = sld [smem:[#allocation8_spill]] (!%p951_p9)  ;;  %vm3979_vm2 = vmmov (!%p951_p9), 0  }
  0x57   : > { %3595 = vmatprep.subr.bf16.mxu1 (!%p951_p9), %v3805_v1  ;;  %v1208_v9 = vunpack.c.l.s4 (!%p951_p9), %v3977_v8  ;;  %v1206_v15 = vcombine.high (!%p951_p9), %v1202_v13, %v1202_v13  ;;  %v3314_v22 = vld [vmem:[%s4015_s25] ss:$0 sm:$0xff] (!%p951_p9)  ;;  %vm1745_vm3 = vcmask (!%p951_p9), 130048   ;;  %vm1830_vm4 = vcmask (!%p951_p9), 1041408   ;;  %s4929_s12 = sld [smem:[#allocation11_spill]] (!%p951_p9)  ;;  %s4930_s6 = sld [smem:[#allocation10_spill]] (!%p951_p9) }
  0x58   : > { %v4232_v24 = vsub.s32 (!%p951_p9), 0, %v1211_v12  ;;  %vm1826_vm5 = vcmask (!%p951_p9), 31744   ;;  %s4931_s1 = sld [smem:[#allocation13_spill]] (!%p951_p9)  ;;  %vm2578_vm6 = vcmask (!%p951_p9), 1043456   ;;  %vm2574_vm7 = vcmask (!%p951_p9), 195584   ;;  %s4948_s4 = sld [smem:[#allocation28_spill]] (!%p951_p9) }
  0x59   : > { %v1209_v11 = vunpack.c.0.s8 (!%p951_p9), %v1208_v9  ;;  %vm2828_vm8 = vcmask (!%p951_p9), 392192   ;;  %vm2923_vm9 = vcmask (!%p951_p9), 1045504   ;;  %vm2919_vm10 = vcmask (!%p951_p9), 97280  }
  0x5a   : > { %3596 = vmatpush3.bf16.msra.mxu1 (!%p951_p9), %v3805_v1 }
  0x5b   : > { %v4222_v14 = vsub.s32 (!%p951_p9), %v1209_v11, %v1211_v12 }
  0x5c   : > { %s1036_s11 = scalar_select %p1035_p10, %s4183_s0, 1 }
  0x5d   : > { %v1213_v16 = vrot.slane %v1202_v13, %v4222_v14  ;;  %v1220_v17 = vrot.slane %v1206_v15, %v4222_v14 }
  0x5e   : > { %s3411_s23 = sshll.u32 %s1036_s11, 5  ;;  %s4932_s11 = sld [smem:[#allocation12_spill]] }
  0x5f   : > { %s1039_s28 = scalar_lea.vmem %s4926_s5, %s3411_s23  ;;  %v1221_v18 = vcombine.high %v1213_v16, %v1213_v16  ;;  %v1229_v19 = vrot.slane %v1213_v16, %v4222_v14  ;;  %v1236_v20 = vrot.slane %v1220_v17, %v4222_v14  ;;  %v1222_v29 = vcombine.high %v1220_v17, %v1220_v17  ;;  %s4933_s23 = sld [smem:[#allocation15_spill]] }
  0x60   : > { %v3806_v2 = vld [vmem:[%s1039_s28] sm:$0xff]   ;;  %v3807_v3 = vld [vmem:[%s1039_s28 + $0x8] sm:$0xff]   ;;  %v3808_v4 = vld [vmem:[%s1039_s28 + $0x10] sm:$0xff]   ;;  %s4943_s5 = sld [smem:[#allocation22_spill]] }
  0x61   : > { %3597 = vmatprep.mubr.msk.bf16.mxu1 %vm1092_vm0, %v3806_v2  ;;  %v3809_v5 = vld [vmem:[%s1039_s28 + $0x18] sm:$0xff]   ;;  %v4229_v21 = vrot.slane %v1221_v18, %v4222_v14  ;;  %v1251_v23 = vcombine.high %v1229_v19, %v1229_v19  ;;  %v1252_v25 = vcombine.high %v1236_v20, %v1236_v20  ;;  %v4245_v38 = vrot.slane %v1229_v19, %v4232_v24  ;;  %s4934_s28 = sld [smem:[#allocation14_spill]] }
  0x62   : > { %3598 = vmatmul.mubr.msk.bf16.vlgmr.msra.gmra.mrb[0].mxu1 %vm1092_vm0, %v3807_v3  ;;  %v4252_v42 = vrot.slane %v1236_v20, %v4232_v24  ;;  %v4258_v44 = vrot.slane %v1222_v29, %v4222_v14 }
  0x63   : > { %3601 = vmatprep.mubr.msk.bf16.mxu1 %vm1092_vm0, %v3808_v4  ;;  %v1253_v30 = vcombine.high %v4229_v21, %v4229_v21  ;;  %v4237_v33 = vrot.slane %v1251_v23, %v4232_v24  ;;  %v4240_v34 = vrot.slane %v1252_v25, %v4232_v24 }
  0x64   : > { %v1254_v17 = vcombine.high %v4258_v44, %v4258_v44 }
  0x65   : > { %v4255_v43 = vrot.slane %v1253_v30, %v4232_v24 }
  0x6a   : > { %3602 = vmatmul.mubr.msk.bf16.gmra.mrb[4].mxu1 %vm1092_vm0, %v3809_v5 }
  0x6b   : > { %1574 = vmatprep.mubr.bf16.mxu1 %v3813_v6 }
 0x135   : > { %v3599_v26 = vpop.f32.mrb[0].mxu1 }
 0x136   : > { %v1148_v27 = vadd.f32 %v3599_v26, %v3314_v22  ;;  %v1139_v28 = vpop.f32.mrb[1].mxu1 }
 0x137   : > { %v1140_v31 = vadd.f32 %v3314_v22, %v1139_v28  ;;  %v3600_v32 = vpop.f32.mrb[2].mxu1 }
 0x138   : > { %v4242_v35 = vmax.f32 %v1148_v27, 0.0  ;;  %v1151_v36 = vadd.f32 %v3600_v32, %v3314_v22  ;;  %v1142_v37 = vpop.f32.mrb[3].mxu1 }
 0x139   : > { %v4247_v39 = vmax.f32 %v1140_v31, 0.0  ;;  %v1143_v40 = vadd.f32 %v3314_v22, %v1142_v37  ;;  %v4329_v37 = vrot.slane %v1254_v17, %v4232_v24 }
 0x13a   : > { %v4249_v41 = vmax.f32 %v1151_v36, 0.0  ;;  %v1332_v47 = vmul.f32 %v4237_v33, %v4242_v35  ;;  %v1364_v48 = vmul.f32 %v4240_v34, %v4242_v35  ;;  %v1316_v61 = vmul.f32 %v4245_v38, %v4242_v35 }
 0x13b   : > { %v4260_v45 = vmax.f32 %v1143_v40, 0.0  ;;  %v1330_v46 = vmul.f32 %v4237_v33, %v4247_v39  ;;  %v1362_v49 = vmul.f32 %v4240_v34, %v4247_v39  ;;  %v1314_v50 = vmul.f32 %v4245_v38, %v4247_v39 }
 0x13c   : > { %v1333_v51 = vmul.f32 %v4237_v33, %v4249_v41  ;;  %v1365_v52 = vmul.f32 %v4240_v34, %v4249_v41  ;;  %v1346_v60 = vmul.f32 %v4252_v42, %v4247_v39  ;;  %v1317_v62 = vmul.f32 %v4245_v38, %v4249_v41 }
 0x13d   : > { %v3603_v53 = vpop.f32.mrb[4].mxu1  ;;  %v1331_v54 = vmul.f32 %v4237_v33, %v4260_v45  ;;  %v1363_v55 = vmul.f32 %v4240_v34, %v4260_v45  ;;  %v1315_v56 = vmul.f32 %v4245_v38, %v4260_v45  ;;  %v1347_v57 = vmul.f32 %v4252_v42, %v4260_v45 }
 0x13e   : > { %v1164_v58 = vadd.f32 %v3603_v53, %v3314_v22  ;;  %v1155_v59 = vpop.f32.mrb[5].mxu1  ;;  %v1395_v7 = vpack.c.bf16 %v1333_v51, %v1332_v47  ;;  %v1411_v8 = vpack.c.bf16 %v1365_v52, %v1364_v48  ;;  %v1348_v11 = vmul.f32 %v4252_v42, %v4242_v35 }
 0x13f   : > { %v1156_v63 = vadd.f32 %v3314_v22, %v1155_v59  ;;  %v3604_v0 = vpop.f32.mrb[6].mxu1  ;;  %v1394_v1 = vpack.c.bf16 %v1331_v54, %v1330_v46  ;;  %v1410_v2 = vpack.c.bf16 %v1363_v55, %v1362_v49  ;;  %v1386_v3 = vpack.c.bf16 %v1315_v56, %v1314_v50 }
 0x140   : > { %v1167_v4 = vadd.f32 %v3604_v0, %v3314_v22  ;;  %v1158_v5 = vpop.f32.mrb[7].mxu1  ;;  %v1402_v6 = vpack.c.bf16 %v1347_v57, %v1346_v60  ;;  %v1349_v12 = vmul.f32 %v4252_v42, %v4249_v41  ;;  %v4296_v13 = vmax.f32 %v1164_v58, 0.0 }
 0x141   : > { %v4290_v9 = vmax.f32 %v1156_v63, 0.0  ;;  %v1159_v10 = vadd.f32 %v3314_v22, %v1158_v5  ;;  %3418 = vmatprep.subr.bf16.mxu1 %v1394_v1  ;;  %3458 = vmatprep.subr.bf16.mxu0 %v1410_v2  ;;  %v1387_v16 = vpack.c.bf16 %v1317_v62, %v1316_v61  ;;  %v1339_v52 = vmul.f32 %v4255_v43, %v4260_v45 }
 0x142   : > { %v4298_v15 = vmax.f32 %v1167_v4, 0.0  ;;  %3419 = vmatpush3.bf16.msra.mxu1 %v1386_v3  ;;  %3459 = vmatpush3.bf16.msra.mxu0 %v1402_v6  ;;  %v1403_v19 = vpack.c.bf16 %v1349_v12, %v1348_v11  ;;  %v1336_v32 = vmul.f32 %v4237_v33, %v4296_v13  ;;  %v1368_v36 = vmul.f32 %v4240_v34, %v4296_v13 }
 0x143   : > { %v4302_v18 = vmax.f32 %v1159_v10, 0.0  ;;  %3420 = vmatprep.subr.bf16.mxu1 %v1395_v7  ;;  %3460 = vmatprep.subr.bf16.mxu0 %v1411_v8  ;;  %v1334_v20 = vmul.f32 %v4237_v33, %v4290_v9  ;;  %v1366_v22 = vmul.f32 %v4240_v34, %v4290_v9  ;;  %v1318_v23 = vmul.f32 %v4245_v38, %v4290_v9  ;;  %v3325_v7 = vld.sshfl [vmem:[%s4020_s29 + $0x8] sm:$0x1 pattern:$0x75316420] }
 0x144   : > { %v1350_v25 = vmul.f32 %v4252_v42, %v4290_v9  ;;  %v1337_v26 = vmul.f32 %v4237_v33, %v4298_v15  ;;  %v1369_v27 = vmul.f32 %v4240_v34, %v4298_v15  ;;  %v1321_v50 = vmul.f32 %v4245_v38, %v4298_v15 }
 0x145   : > { %v1335_v28 = vmul.f32 %v4237_v33, %v4302_v18  ;;  %v1367_v29 = vmul.f32 %v4240_v34, %v4302_v18  ;;  %v1319_v30 = vmul.f32 %v4245_v38, %v4302_v18  ;;  %v1351_v31 = vmul.f32 %v4252_v42, %v4302_v18 }
 0x146   : > { %3421 = vmatpush3.bf16.msra.mxu1 %v1387_v16  ;;  %3461 = vmatpush3.bf16.msra.mxu0 %v1403_v19  ;;  %v1397_v49 = vpack.c.bf16 %v1337_v26, %v1336_v32  ;;  %v1353_v51 = vmul.f32 %v4252_v42, %v4298_v15  ;;  %v4337_v33 = vrot.slane %v4229_v21, %v4232_v24 }
 0x147   : > { %v1396_v40 = vpack.c.bf16 %v1335_v28, %v1334_v20  ;;  %v1412_v46 = vpack.c.bf16 %v1367_v29, %v1366_v22  ;;  %v1388_v47 = vpack.c.bf16 %v1319_v30, %v1318_v23  ;;  %v1404_v48 = vpack.c.bf16 %v1351_v31, %v1350_v25 }
 0x148   : > { %v1413_v34 = vpack.c.bf16 %v1369_v27, %v1368_v36  ;;  %v1371_v53 = vmul.f32 %v4329_v37, %v4260_v45  ;;  %v1320_v54 = vmul.f32 %v4245_v38, %v4296_v13  ;;  %v1352_v55 = vmul.f32 %v4252_v42, %v4296_v13 }
 0x149   : > { %3422 = vmatprep.subr.bf16.mxu1 %v1396_v40  ;;  %3462 = vmatprep.subr.bf16.mxu0 %v1412_v46  ;;  %v4349_v21 = vrot.slane %v4258_v44, %v4232_v24  ;;  %v1338_v56 = vmul.f32 %v4255_v43, %v4247_v39  ;;  %v1370_v57 = vmul.f32 %v4329_v37, %v4247_v39 }
 0x14a   : > { %3423 = vmatpush3.bf16.msra.mxu1 %v1388_v47  ;;  %3463 = vmatpush3.bf16.msra.mxu0 %v1404_v48  ;;  %v1389_v58 = vpack.c.bf16 %v1321_v50, %v1320_v54  ;;  %v1405_v59 = vpack.c.bf16 %v1353_v51, %v1352_v55  ;;  %v1323_v38 = vmul.f32 %v4337_v33, %v4260_v45 }
 0x14b   : > { %3424 = vmatprep.subr.bf16.mxu1 %v1397_v49  ;;  %3464 = vmatprep.subr.bf16.mxu0 %v1413_v34  ;;  %v1355_v42 = vmul.f32 %v4349_v21, %v4260_v45  ;;  %v1398_v60 = vpack.c.bf16 %v1339_v52, %v1338_v56  ;;  %v1414_v44 = vpack.c.bf16 %v1371_v53, %v1370_v57 }
 0x14c   : > { %v1341_v61 = vmul.f32 %v4255_v43, %v4249_v41  ;;  %v1373_v62 = vmul.f32 %v4329_v37, %v4249_v41  ;;  %v1322_v63 = vmul.f32 %v4337_v33, %v4247_v39  ;;  %v1354_v0 = vmul.f32 %v4349_v21, %v4247_v39 }
 0x14d   : > { %v1340_v1 = vmul.f32 %v4255_v43, %v4242_v35  ;;  %v1372_v2 = vmul.f32 %v4329_v37, %v4242_v35  ;;  %v1325_v5 = vmul.f32 %v4337_v33, %v4249_v41  ;;  %v1357_v6 = vmul.f32 %v4349_v21, %v4249_v41 }
 0x14e   : > { %3425 = vmatpush3.bf16.msra.mxu1 %v1389_v58  ;;  %3465 = vmatpush3.bf16.msra.mxu0 %v1405_v59  ;;  %v1390_v3 = vpack.c.bf16 %v1323_v38, %v1322_v63  ;;  %v1406_v4 = vpack.c.bf16 %v1355_v42, %v1354_v0  ;;  %v1343_v11 = vmul.f32 %v4255_v43, %v4302_v18  ;;  %v3811_v58 = vld [vmem:[%s4923_s9] ss:$20 sps:$4 sm:$0xff]   ;;  %v3814_v59 = vld [vmem:[%s4923_s9 + $0x8] ss:$20 sps:$4 sm:$0xff]   ;;  %v3822_v0 = vld [vmem:[%s4923_s9 + $0x30] ss:$20 sps:$4 sm:$0xff]  }
 0x14f   : > { %3426 = vmatprep.subr.bf16.mxu1 %v1398_v60  ;;  %3466 = vmatprep.subr.bf16.mxu0 %v1414_v44  ;;  %v1399_v8 = vpack.c.bf16 %v1341_v61, %v1340_v1  ;;  %v1415_v10 = vpack.c.bf16 %v1373_v62, %v1372_v2  ;;  %v1375_v12 = vmul.f32 %v4329_v37, %v4302_v18  ;;  %v3819_v63 = vld [vmem:[%s4923_s9 + $0x28] ss:$20 sps:$4 sm:$0xff]  }
 0x150   : > { %v1324_v16 = vmul.f32 %v4337_v33, %v4242_v35  ;;  %v1356_v17 = vmul.f32 %v4349_v21, %v4242_v35  ;;  %v1342_v19 = vmul.f32 %v4255_v43, %v4290_v9  ;;  %v1374_v20 = vmul.f32 %v4329_v37, %v4290_v9  ;;  %v3823_v2 = vld [vmem:[%s4923_s9 + $0x54] ss:$20 sps:$4 sm:$0xff]  }
 0x151   : > { %v1268_v22 = vrot.slane %v3325_v7, %v4222_v14  ;;  %v1327_v26 = vmul.f32 %v4337_v33, %v4302_v18  ;;  %v1359_v27 = vmul.f32 %v4349_v21, %v4302_v18  ;;  %v1345_v30 = vmul.f32 %v4255_v43, %v4298_v15  ;;  %v3828_v7 = vld [vmem:[%s4923_s9 + $0x58] ss:$20 sps:$4 sm:$0xff]  }
 0x152   : > { %3427 = vmatpush3.bf16.msra.mxu1 %v1390_v3  ;;  %3467 = vmatpush3.bf16.msra.mxu0 %v1406_v4  ;;  %v1391_v23 = vpack.c.bf16 %v1325_v5, %v1324_v16  ;;  %v1407_v25 = vpack.c.bf16 %v1357_v6, %v1356_v17  ;;  %v1400_v28 = vpack.c.bf16 %v1343_v11, %v1342_v19  ;;  %v3826_v4 = vld [vmem:[%s4923_s9 + $0x5c] ss:$20 sps:$4 sm:$0xff]   ;;  %v3831_v11 = vld [vmem:[%s4923_s9 + $0x78] ss:$20 sps:$4 sm:$0xff]   ;;  %v3837_v19 = vld [vmem:[%s4923_s9 + $0x60] ss:$20 sps:$4 sm:$0xff]  }
 0x153   : > { %3428 = vmatprep.subr.bf16.mxu1 %v1399_v8  ;;  %3468 = vmatprep.subr.bf16.mxu0 %v1415_v10  ;;  %v1416_v29 = vpack.c.bf16 %v1375_v12, %v1374_v20  ;;  %v1377_v31 = vmul.f32 %v4329_v37, %v4298_v15  ;;  %v1326_v32 = vmul.f32 %v4337_v33, %v4290_v9  ;;  %v3825_v6 = vld [vmem:[%s4923_s9 + $0x50] ss:$20 sps:$4 sm:$0xff]   ;;  %v3834_v12 = vld [vmem:[%s4923_s9 + $0x80] ss:$20 sps:$4 sm:$0xff]   ;;  %v3836_v17 = vld [vmem:[%s4923_s9 + $0x38] ss:$20 sps:$4 sm:$0xff]  }
 0x154   : > { %v1358_v36 = vmul.f32 %v4349_v21, %v4290_v9  ;;  %v1344_v40 = vmul.f32 %v4255_v43, %v4296_v13  ;;  %v1376_v46 = vmul.f32 %v4329_v37, %v4296_v13  ;;  %v1304_v47 = vrot.slane %v1268_v22, %v4232_v24  ;;  %v3829_v8 = vld [vmem:[%s4923_s9 + $0x7c] ss:$20 sps:$4 sm:$0xff]   ;;  %v3832_v10 = vld [vmem:[%s4923_s9 + $0x84] ss:$20 sps:$4 sm:$0xff]  }
 0x155   : > { %v1392_v48 = vpack.c.bf16 %v1327_v26, %v1326_v32  ;;  %v1329_v50 = vmul.f32 %v4337_v33, %v4298_v15  ;;  %v1361_v51 = vmul.f32 %v4349_v21, %v4298_v15  ;;  %v1328_v43 = vmul.f32 %v4337_v33, %v4296_v13  ;;  %v3817_v33 = vld [vmem:[%s4923_s9 + $0x2c] ss:$20 sps:$4 sm:$0xff]   ;;  %v3835_v16 = vld [vmem:[%s4923_s9 + $0x10] ss:$20 sps:$4 sm:$0xff]   ;;  %v3838_v20 = vld [vmem:[%s4923_s9 + $0x88] ss:$20 sps:$4 sm:$0xff]  }
 0x156   : > { %3429 = vmatpush3.bf16.msra.mxu1 %v1391_v23  ;;  %3469 = vmatpush3.bf16.msra.mxu0 %v1407_v25  ;;  %v1408_v49 = vpack.c.bf16 %v1359_v27, %v1358_v36  ;;  %v1401_v34 = vpack.c.bf16 %v1345_v30, %v1344_v40  ;;  %v1417_v52 = vpack.c.bf16 %v1377_v31, %v1376_v46  ;;  %v3978_v22 = vmov 0.0   ;;  %v3839_v23 = vld [vmem:[%s4927_s8] sm:$0xff]  }
 0x157   : > { %3430 = vmatprep.subr.bf16.mxu1 %v1400_v28  ;;  %3470 = vmatprep.subr.bf16.mxu0 %v1416_v29  ;;  %v1379_v53 = vmul.f32 %v1304_v47, %v4260_v45  ;;  %v1360_v37 = vmul.f32 %v4349_v21, %v4296_v13  ;;  %v1378_v54 = vmul.f32 %v1304_v47, %v4247_v39  ;;  %v3820_v21 = vld [vmem:[%s4923_s9 + $0x34] ss:$20 sps:$4 sm:$0xff]   ;;  %v3326_v27 = vld [vmem:[%s4928_s3] ss:$0 sm:$0xff]  ;;  %s4938_s3 = sld [smem:[#allocation19_spill]] }
 0x158   : > { %v1393_v55 = vpack.c.bf16 %v1329_v50, %v1328_v43  ;;  %v1381_v38 = vmul.f32 %v1304_v47, %v4249_v41  ;;  %v1380_v42 = vmul.f32 %v1304_v47, %v4242_v35  ;;  %v1383_v44 = vmul.f32 %v1304_v47, %v4302_v18 }
 0x159   : > { %v1409_v56 = vpack.c.bf16 %v1361_v51, %v1360_v37  ;;  %v1418_v57 = vpack.c.bf16 %v1379_v53, %v1378_v54  ;;  %v1382_v61 = vmul.f32 %v1304_v47, %v4290_v9  ;;  %v1385_v1 = vmul.f32 %v1304_v47, %v4298_v15 }
 0x15a   : > { %3431 = vmatpush3.bf16.msra.mxu1 %v1392_v48  ;;  %3471 = vmatpush3.bf16.msra.mxu0 %v1408_v49  ;;  %v1419_v60 = vpack.c.bf16 %v1381_v38, %v1380_v42  ;;  %v1384_v3 = vmul.f32 %v1304_v47, %v4296_v13 }
 0x15b   : > { %3432 = vmatprep.subr.bf16.mxu1 %v1401_v34  ;;  %3472 = vmatprep.subr.bf16.mxu0 %v1417_v52  ;;  %v1420_v62 = vpack.c.bf16 %v1383_v44, %v1382_v61 }
 0x15c   : > { %v1421_v5 = vpack.c.bf16 %v1385_v1, %v1384_v3 }
 0x15e   : > { %3433 = vmatpush3.bf16.msra.mxu1 %v1393_v55  ;;  %3473 = vmatpush3.bf16.msra.mxu0 %v1409_v56 }
 0x15f   : > { %3605 = vmatprep.subr.bf16.mxu1 %v1418_v57  ;;  %3621 = vmatprep.subr.bf16.mxu0 %v3978_v22 }
 0x161   : > { %1575 = vmatmul.mubr.bf16.vlgmr.msra.gmra.mrb[8].mxu1 %v3811_v58  ;;  %1640 = vmatmul.mubr.bf16.vlgmr.msra.gmra.mrb[0].mxu0 %v3814_v59 }
 0x162   : > { %3606 = vmatpush3.bf16.msra.mxu1 %v1418_v57  ;;  %1582 = vmatprep.mubr.bf16.mxu1 %v3817_v33 }
 0x163   : > { %3607 = vmatprep.subr.bf16.mxu1 %v1419_v60  ;;  %1647 = vmatprep.mubr.bf16.mxu0 %v3820_v21 }
 0x164   : > { %3622 = vmatpush3.bf16.msra.mxu0 %v3839_v23 }
 0x165   : > { %3627 = vmatprep.subr.bf16.mxu0 %v3978_v22 }
 0x166   : > { %3608 = vmatpush3.bf16.msra.mxu1 %v1419_v60 }
 0x167   : > { %3609 = vmatprep.subr.bf16.mxu1 %v1420_v62 }
 0x169   : > { %1583 = vmatmul.mubr.bf16.gmra.mrb[12].mxu1 %v3819_v63  ;;  %1648 = vmatmul.mubr.bf16.gmra.mrb[4].mxu0 %v3822_v0 }
 0x16a   : > { %3610 = vmatpush3.bf16.msra.mxu1 %v1420_v62  ;;  %1590 = vmatprep.mubr.bf16.mxu1 %v3823_v2 }
 0x16b   : > { %3611 = vmatprep.subr.bf16.mxu1 %v1421_v5  ;;  %1655 = vmatprep.mubr.bf16.mxu0 %v3826_v4 }
 0x16e   : > { %3612 = vmatpush3.bf16.msra.mxu1 %v1421_v5 }
 0x171   : > { %1591 = vmatmul.mubr.bf16.gmra.mrb[16].mxu1 %v3825_v6  ;;  %1656 = vmatmul.mubr.bf16.gmra.mrb[8].mxu0 %v3828_v7 }
 0x172   : > { %1598 = vmatprep.mubr.bf16.mxu1 %v3829_v8  ;;  %1663 = vmatprep.mubr.bf16.mxu0 %v3832_v10 }
 0x179   : > { %1599 = vmatmul.mubr.bf16.gmra.mrb[20].mxu1 %v3831_v11  ;;  %1664 = vmatmul.mubr.bf16.gmra.mrb[12].mxu0 %v3834_v12 }
 0x17a   : > { %3613 = vmatprep.mubr.msk.bf16.mxu1 %vm1529_vm1, %v3835_v16  ;;  %3623 = vmatprep.mubr.msk.bf16.mxu0 %vm3979_vm2, %v3978_v22 }
 0x181   : > { %3614 = vmatmul.mubr.msk.bf16.vlgmr.msra.gmra.mrb[24].mxu1 %vm1529_vm1, %v3836_v17 }
 0x182   : > { %3617 = vmatprep.mubr.msk.bf16.mxu1 %vm1529_vm1, %v3837_v19 }
 0x189   : > { %3618 = vmatmul.mubr.msk.bf16.gmra.mrb[28].mxu1 %vm1529_vm1, %v3838_v20 }
 0x234   : > { %v3434_v25 = vpop.f32.mrb[8].mxu1  ;;  %v3474_v26 = vpop.f32.mrb[0].mxu0 }
 0x235   : > { %v3435_v28 = vpop.f32.mrb[9].mxu1  ;;  %v3475_v29 = vpop.f32.mrb[1].mxu0 }
 0x236   : > { %v3436_v30 = vadd.f32 %v3435_v28, %v3434_v25  ;;  %v3437_v31 = vpop.f32.mrb[10].mxu1  ;;  %v3476_v32 = vadd.f32 %v3475_v29, %v3474_v26  ;;  %v3477_v36 = vpop.f32.mrb[2].mxu0 }
 0x237   : > { %v3438_v40 = vpop.f32.mrb[11].mxu1  ;;  %v3478_v46 = vpop.f32.mrb[3].mxu0 }
 0x238   : > { %v1577_v47 = vadd.f32 %v3436_v30, %v3326_v27  ;;  %v3439_v48 = vadd.f32 %v3438_v40, %v3437_v31  ;;  %v3479_v49 = vadd.f32 %v3478_v46, %v3477_v36 }
 0x23a   : > { %v1580_v50 = vadd.f32 %v3439_v48, %v3326_v27  ;;  %v1642_v51 = vadd.f32 %v3476_v32, %v1577_v47 }
 0x23c   : > { %v3440_v34 = vpop.f32.mrb[12].mxu1  ;;  %v3480_v52 = vpop.f32.mrb[4].mxu0  ;;  %v1645_v53 = vadd.f32 %v3479_v49, %v1580_v50 }
 0x23d   : > { %v3441_v43 = vpop.f32.mrb[13].mxu1  ;;  %v3481_v37 = vpop.f32.mrb[5].mxu0 }
 0x23e   : > { %v3442_v54 = vadd.f32 %v3441_v43, %v3440_v34  ;;  %v3443_v55 = vpop.f32.mrb[14].mxu1  ;;  %v3482_v56 = vadd.f32 %v3481_v37, %v3480_v52  ;;  %v3483_v57 = vpop.f32.mrb[6].mxu0 }
 0x23f   : > { %v3444_v58 = vpop.f32.mrb[15].mxu1  ;;  %v3484_v59 = vpop.f32.mrb[7].mxu0 }
 0x240   : > { %v1585_v38 = vadd.f32 %v3442_v54, %v3326_v27  ;;  %v3445_v33 = vadd.f32 %v3444_v58, %v3443_v55  ;;  %v3485_v42 = vadd.f32 %v3484_v59, %v3483_v57 }
 0x242   : > { %v1588_v21 = vadd.f32 %v3445_v33, %v3326_v27  ;;  %v1650_v60 = vadd.f32 %v3482_v56, %v1585_v38 }
 0x244   : > { %v3446_v44 = vpop.f32.mrb[16].mxu1  ;;  %v3486_v61 = vpop.f32.mrb[8].mxu0  ;;  %v1653_v62 = vadd.f32 %v3485_v42, %v1588_v21 }
 0x245   : > { %v3447_v63 = vpop.f32.mrb[17].mxu1  ;;  %v3487_v0 = vpop.f32.mrb[9].mxu0 }
 0x246   : > { %v3448_v1 = vadd.f32 %v3447_v63, %v3446_v44  ;;  %v3449_v2 = vpop.f32.mrb[18].mxu1  ;;  %v3488_v3 = vadd.f32 %v3487_v0, %v3486_v61  ;;  %v3489_v4 = vpop.f32.mrb[10].mxu0 }
 0x247   : > { %v3450_v5 = vpop.f32.mrb[19].mxu1  ;;  %v3490_v6 = vpop.f32.mrb[11].mxu0 }
 0x248   : > { %v1593_v7 = vadd.f32 %v3448_v1, %v3326_v27  ;;  %v3451_v8 = vadd.f32 %v3450_v5, %v3449_v2  ;;  %v3491_v10 = vadd.f32 %v3490_v6, %v3489_v4 }
 0x24a   : > { %v1596_v11 = vadd.f32 %v3451_v8, %v3326_v27  ;;  %v1658_v12 = vadd.f32 %v3488_v3, %v1593_v7 }
 0x24c   : > { %v3452_v16 = vpop.f32.mrb[20].mxu1  ;;  %v3492_v17 = vpop.f32.mrb[12].mxu0  ;;  %v1661_v19 = vadd.f32 %v3491_v10, %v1596_v11 }
 0x24d   : > { %v3453_v20 = vpop.f32.mrb[21].mxu1  ;;  %v3493_v23 = vpop.f32.mrb[13].mxu0 }
 0x24e   : > { %v3454_v25 = vadd.f32 %v3453_v20, %v3452_v16  ;;  %v3455_v26 = vpop.f32.mrb[22].mxu1  ;;  %v3494_v28 = vadd.f32 %v3493_v23, %v3492_v17  ;;  %v3495_v29 = vpop.f32.mrb[14].mxu0 }
 0x24f   : > { %v3456_v30 = vpop.f32.mrb[23].mxu1  ;;  %v3496_v31 = vpop.f32.mrb[15].mxu0 }
 0x250   : > { %v1601_v32 = vadd.f32 %v3454_v25, %v3326_v27  ;;  %v3457_v36 = vadd.f32 %v3456_v30, %v3455_v26  ;;  %v3497_v40 = vadd.f32 %v3496_v31, %v3495_v29 }
 0x252   : > { %v1604_v46 = vadd.f32 %v3457_v36, %v3326_v27  ;;  %v1666_v47 = vadd.f32 %v3494_v28, %v1601_v32  ;;  %v1824_v32 = vld [vmem:[%s4040_s19] sm:$0x3] }
 0x253   : > { %v1832_v36 = vsel %vm1830_vm4, %v1824_v32, 0 }
 0x254   : > { %v3615_v48 = vpop.f32.mrb[24].mxu1  ;;  %v1669_v49 = vadd.f32 %v3497_v40, %v1604_v46  ;;  %v1772_v40 = vld [vmem:[%s4035_s14] sm:$0x1] }
 0x255   : > { %v4450_v50 = vadd.f32 %v3615_v48, %v1650_v60  ;;  %v1706_v34 = vpop.f32.mrb[25].mxu1 }
 0x256   : > { %v4452_v52 = vadd.f32 %v1706_v34, %v1642_v51  ;;  %v3616_v43 = vpop.f32.mrb[26].mxu1 }
 0x257   : > { %v4454_v37 = vadd.f32 %v3616_v43, %v1653_v62  ;;  %v1709_v54 = vpop.f32.mrb[27].mxu1  ;;  %v1739_v57 = vmax.f32 %v4450_v50, 0.0 }
 0x258   : > { %v1737_v55 = vmax.f32 %v4452_v52, 0.0  ;;  %v4457_v56 = vadd.f32 %v1709_v54, %v1645_v53 }
 0x259   : > { %v1740_v51 = vmax.f32 %v4454_v37, 0.0  ;;  %v1749_v21 = vsel %vm1745_vm3, %v1739_v57, 0.0  ;;  %v3841_v37 = vld [vmem:[%s4929_s12] sm:$0xff]  }
 0x25a   : > { %v1738_v27 = vmax.f32 %v4457_v56, 0.0  ;;  %v1746_v58 = vsel %vm1745_vm3, %v1737_v55, 0.0  ;;  %v3355_v56 = vld [vmem:[%s4930_s6] ss:$0 sm:$0xff]  ;;  %s4945_s6 = sld [smem:[#allocation24_spill]] }
 0x25b   : > { %v1751_v0 = vsel %vm1745_vm3, %v1740_v51, 0.0 }
 0x25c   : > { %v1747_v59 = vsel %vm1745_vm3, %v1738_v27, 0.0  ;;  %v3619_v38 = vpop.f32.mrb[28].mxu1 }
 0x25d   : > { %v1748_v33 = vadd.f32 %v1747_v59, %v1746_v58  ;;  %v4468_v42 = vadd.f32 %v3619_v38, %v1666_v47  ;;  %v1722_v53 = vpop.f32.mrb[29].mxu1  ;;  %v3840_v58 = vld [vmem:[%s4050_s30] sm:$0xff]  }
 0x25e   : > { %v4473_v60 = vadd.f32 %v1722_v53, %v1658_v12  ;;  %v3620_v44 = vpop.f32.mrb[30].mxu1  ;;  %3633 = vmatprep.subr.bf16.mxu1 %v3840_v58  ;;  %v1825_v59 = vld [vmem:[%s4045_s24] sm:$0x1] }
 0x25f   : > { %v1750_v61 = vadd.f32 %v1749_v21, %v1748_v33  ;;  %v4475_v62 = vadd.f32 %v3620_v44, %v1669_v49  ;;  %v1725_v63 = vpop.f32.mrb[31].mxu1  ;;  %v1743_v4 = vmax.f32 %v4468_v42, 0.0  ;;  %3634 = vmatpush3.bf16.msra.mxu1 %v3840_v58 }
 0x260   : > { %v1741_v1 = vmax.f32 %v4473_v60, 0.0  ;;  %v1726_v2 = vadd.f32 %v1725_v63, %v1661_v19 }
 0x261   : > { %v1752_v3 = vadd.f32 %v1751_v0, %v1750_v61  ;;  %v1744_v8 = vmax.f32 %v4475_v62, 0.0  ;;  %v1757_v12 = vsel %vm1745_vm3, %v1743_v4, 0.0 }
 0x262   : > { %v1753_v5 = vsel %vm1745_vm3, %v1741_v1, 0.0  ;;  %v1742_v6 = vmax.f32 %v1726_v2, 0.0 }
 0x263   : > { %v1754_v7 = vadd.f32 %v1753_v5, %v1752_v3  ;;  %v1759_v17 = vsel %vm1745_vm3, %v1744_v8, 0.0 }
 0x264   : > { %v1755_v10 = vsel %vm1745_vm3, %v1742_v6, 0.0 }
 0x265   : > { %v1756_v11 = vadd.f32 %v1755_v10, %v1754_v7 }
 0x267   : > { %v1758_v16 = vadd.f32 %v1757_v12, %v1756_v11 }
 0x269   : > { %v1760_v19 = vadd.f32 %v1759_v17, %v1758_v16 }
 0x26b   : > { %v1761_v20 = vrot.slane %v1760_v19, 4 }
 0x26d   : > { %v1762_v23 = vadd.f32 %v1761_v20, %v1760_v19 }
 0x26f   : > { %v1763_v25 = vrot.slane %v1762_v23, 2 }
 0x271   : > { %v1764_v26 = vadd.f32 %v1763_v25, %v1762_v23 }
 0x273   : > { %v1765_v28 = vrot.slane %v1764_v26, 1 }
 0x275   : > { %v1766_v29 = vadd.f32 %v1765_v28, %v1764_v26 }
 0x277   : > { %v1768_v30 = vmul.f32 0.015625, %v1766_v29 }
 0x279   : > { %v1769_v31 = vpack.c.bf16 %v1768_v30, %v1768_v30 }
 0x27b   : > { %3624 = vmatmul.mubr.msk.bf16.vlgmr.msra.gmra.mrb[16].mxu0 %vm1745_vm3, %v1769_v31 }
 0x27c   : > { %3629 = vmatprep.mubr.msk.bf16.mxu0 %vm3979_vm2, %v3978_v22  ;;  %3628 = vmatpush3.bf16.msra.mxu0 %v1832_v36 }
 0x27d   : > { %3643 = vmatprep.subr.bf16.mxu0 %v3841_v37 }
 0x34e   : > { %v1816_v46 = vpop.f32.mrb[16].mxu0 }
 0x34f   : > { %v1817_v47 = vadd.f32 %v1816_v46, %v1772_v40  ;;  %v3625_v48 = vpop.f32.mrb[17].mxu0 }
 0x350   : > { %v1819_v49 = vpop.f32.mrb[18].mxu0 }
 0x351   : > { %v1822_v34 = vmax.f32 %v1817_v47, 0.0  ;;  %v3626_v43 = vpop.f32.mrb[19].mxu0 }
 0x352   : > { %v3848_v43 = vld [vmem:[%s4000_s13 + $0xc] ss:$20 sps:$4 sm:$0xff]  }
 0x353   : > { %v1823_v54 = vpack.c.bf16 %v1822_v34, %v1822_v34  ;;  %v3845_v34 = vld [vmem:[%s4000_s13 + $0x4] ss:$20 sps:$4 sm:$0xff]  }
 0x355   : > { %3630 = vmatmul.mubr.msk.bf16.vlgmr.msra.gmra.mrb[20].mxu0 %vm1826_vm5, %v1823_v54  ;;  %v2106_v54 = vld [vmem:[%s4931_s1] sm:$0xff] }
 0x356   : > { %3644 = vmatpush3.bf16.msra.mxu0 %v3841_v37 }
 0x428   : > { %v1868_v38 = vpop.f32.mrb[20].mxu0 }
 0x429   : > { %v1869_v33 = vadd.f32 %v1868_v38, %v1825_v59  ;;  %v3631_v53 = vpop.f32.mrb[21].mxu0 }
 0x42a   : > { %v1871_v21 = vpop.f32.mrb[22].mxu0 }
 0x42b   : > { %v3354_v60 = vmul.f32 -1.442695, %v1869_v33  ;;  %v3632_v44 = vpop.f32.mrb[23].mxu0 }
 0x42c   : > { %v3367_v44 = vld.sshfl [vmem:[%s4931_s1 + $0x8] sm:$0x1 pattern:$0x75316420]  ;;  %s4937_s1 = sld [smem:[#allocation7_spill]] }
 0x42d   : > { %3871 = vpow2.f32 %v3354_v60 }
 0x437   : > { %v3872_v61 = vpop.eup %3871 }
 0x438   : > { %v1877_v62 = vadd.f32 1.0, %v3872_v61  ;;  %v3361_v61 = vld [vmem:[%s4932_s11] ss:$0 sm:$0xff]  ;;  %s4935_s11 = sld [smem:[#allocation17_spill]] }
 0x43a   : > { %3873 = vrcp.f32 %v1877_v62 }
 0x444   : > { %v3874_v63 = vpop.eup %3873 }
 0x445   : > { %v1883_v0 = vrot.slane %v3874_v63, %v4232_v24 }
 0x447   : > { %v1884_v2 = vmul.f32 %v1883_v0, %v1737_v55  ;;  %v1885_v3 = vmul.f32 %v1883_v0, %v1738_v27  ;;  %v1886_v5 = vmul.f32 %v1883_v0, %v1739_v57  ;;  %v1887_v7 = vmul.f32 %v1883_v0, %v1740_v51 }
 0x448   : > { %v1888_v10 = vmul.f32 %v1883_v0, %v1741_v1  ;;  %v1889_v11 = vmul.f32 %v1883_v0, %v1742_v6  ;;  %v1890_v52 = vmul.f32 %v1883_v0, %v1743_v4  ;;  %v1891_v50 = vmul.f32 %v1883_v0, %v1744_v8 }
 0x449   : > { %v1892_v12 = vpack.c.bf16 %v1885_v3, %v1884_v2  ;;  %v1893_v16 = vpack.c.bf16 %v1887_v7, %v1886_v5  ;;  %v2172_v2 = vrot.slane %v3367_v44, %v4222_v14 }
 0x44a   : > { %v1894_v17 = vpack.c.bf16 %v1889_v11, %v1888_v10  ;;  %v1895_v55 = vpack.c.bf16 %v1891_v50, %v1890_v52 }
 0x44b   : > { %3635 = vmatprep.mubr.msk.bf16.mxu1 %vm1745_vm3, %v1892_v12 }
 0x44c   : > { %3636 = vmatmul.mubr.msk.bf16.vlgmr.msra.gmra.mrb[32].mxu1 %vm1745_vm3, %v1893_v16 }
 0x44d   : > { %3639 = vmatprep.mubr.msk.bf16.mxu1 %vm1745_vm3, %v1894_v17 }
 0x454   : > { %3640 = vmatmul.mubr.msk.bf16.gmra.mrb[36].mxu1 %vm1745_vm3, %v1895_v55 }
 0x455   : > { %2393 = vmatprep.mubr.bf16.mxu1 %v3845_v34 }
 0x51f   : > { %v3637_v57 = vpop.f32.mrb[32].mxu1 }
 0x520   : > { %v1966_v27 = vadd.f32 %v3637_v57, %v3355_v56  ;;  %v1957_v51 = vpop.f32.mrb[33].mxu1 }
 0x521   : > { %v1958_v1 = vadd.f32 %v3355_v56, %v1957_v51  ;;  %v3638_v6 = vpop.f32.mrb[34].mxu1 }
 0x522   : > { %v1969_v19 = vadd.f32 %v3638_v6, %v3355_v56  ;;  %v1960_v20 = vpop.f32.mrb[35].mxu1  ;;  %v1990_v25 = vadd.f32 %v1966_v27, %v4242_v35  ;;  %v4566_v6 = vrot.slane %v2172_v2, %v4232_v24 }
 0x523   : > { %v1961_v23 = vadd.f32 %v3355_v56, %v1960_v20  ;;  %v1988_v4 = vadd.f32 %v1958_v1, %v4247_v39 }
 0x524   : > { %v1991_v42 = vadd.f32 %v1969_v19, %v4249_v41 }
 0x525   : > { %v1989_v8 = vadd.f32 %v1961_v23, %v4260_v45 }
 0x526   : > { %v1997_v26 = vpack.c.bf16 %v1991_v42, %v1990_v25 }
 0x527   : > { %v1996_v28 = vpack.c.bf16 %v1989_v8, %v1988_v4  ;;  %v3641_v29 = vpop.f32.mrb[36].mxu1 }
 0x528   : > { %v1982_v30 = vadd.f32 %v3641_v29, %v3355_v56  ;;  %v1973_v31 = vpop.f32.mrb[37].mxu1 }
 0x529   : > { %v1974_v32 = vadd.f32 %v3355_v56, %v1973_v31  ;;  %v3642_v36 = vpop.f32.mrb[38].mxu1  ;;  %3645 = vmatprep.mubr.msk.bf16.mxu0 %vm1745_vm3, %v1996_v28 }
 0x52a   : > { %v1985_v40 = vadd.f32 %v3642_v36, %v3355_v56  ;;  %v1976_v35 = vpop.f32.mrb[39].mxu1  ;;  %3646 = vmatmul.mubr.msk.bf16.vlgmr.msra.gmra.mrb[24].mxu0 %vm1745_vm3, %v1997_v26  ;;  %v1994_v39 = vadd.f32 %v1982_v30, %v4296_v13  ;;  %v2110_v13 = vcombine.high %v2106_v54, %v2106_v54 }
 0x52b   : > { %v1977_v41 = vadd.f32 %v3355_v56, %v1976_v35  ;;  %v1992_v46 = vadd.f32 %v1974_v32, %v4290_v9 }
 0x52c   : > { %v1995_v45 = vadd.f32 %v1985_v40, %v4298_v15  ;;  %v2117_v15 = vrot.slane %v2106_v54, %v4222_v14  ;;  %v2124_v9 = vrot.slane %v2110_v13, %v4222_v14 }
 0x52d   : > { %v1993_v47 = vadd.f32 %v1977_v41, %v4302_v18 }
 0x52e   : > { %v1999_v48 = vpack.c.bf16 %v1995_v45, %v1994_v39  ;;  %v2125_v58 = vcombine.high %v2117_v15, %v2117_v15  ;;  %v2126_v18 = vcombine.high %v2124_v9, %v2124_v9  ;;  %v2133_v59 = vrot.slane %v2117_v15, %v4222_v14 }
 0x52f   : > { %v1998_v49 = vpack.c.bf16 %v1993_v47, %v1992_v46  ;;  %v2140_v38 = vrot.slane %v2124_v9, %v4222_v14 }
 0x530   : > { %v2147_v33 = vrot.slane %v2125_v58, %v4222_v14  ;;  %v2154_v53 = vrot.slane %v2126_v18, %v4222_v14  ;;  %v2155_v21 = vcombine.high %v2133_v59, %v2133_v59  ;;  %v4544_v11 = vrot.slane %v2133_v59, %v4232_v24 }
 0x531   : > { %3649 = vmatprep.mubr.msk.bf16.mxu0 %vm1745_vm3, %v1998_v49  ;;  %v2156_v60 = vcombine.high %v2140_v38, %v2140_v38  ;;  %v4547_v17 = vrot.slane %v2140_v38, %v4232_v24 }
 0x532   : > { %3650 = vmatmul.mubr.msk.bf16.gmra.mrb[28].mxu0 %vm1745_vm3, %v1999_v48  ;;  %v2157_v62 = vcombine.high %v2147_v33, %v2147_v33  ;;  %v2158_v0 = vcombine.high %v2154_v53, %v2154_v53  ;;  %v4538_v7 = vrot.slane %v2155_v21, %v4232_v24  ;;  %v4550_v52 = vrot.slane %v2147_v33, %v4232_v24 }
 0x533   : > { %2434 = vmatprep.mubr.bf16.mxu0 %v3848_v43  ;;  %v4541_v10 = vrot.slane %v2156_v60, %v4232_v24  ;;  %v4558_v57 = vrot.slane %v2154_v53, %v4232_v24 }
 0x534   : > { %v4555_v56 = vrot.slane %v2157_v62, %v4232_v24  ;;  %v4563_v1 = vrot.slane %v2158_v0, %v4232_v24 }
 0x5fd   : > { %v3647_v63 = vpop.f32.mrb[24].mxu0 }
 0x5fe   : > { %v2070_v3 = vadd.f32 %v3647_v63, %v3361_v61  ;;  %v2061_v5 = vpop.f32.mrb[25].mxu0 }
 0x5ff   : > { %v2062_v12 = vadd.f32 %v3361_v61, %v2061_v5  ;;  %v3648_v16 = vpop.f32.mrb[26].mxu0 }
 0x600   : > { %v4552_v50 = vmax.f32 %v2070_v3, 0.0  ;;  %v2073_v55 = vadd.f32 %v3648_v16, %v3361_v61  ;;  %v2064_v37 = vpop.f32.mrb[27].mxu0 }
 0x601   : > { %v4560_v27 = vmax.f32 %v2062_v12, 0.0  ;;  %v2065_v51 = vadd.f32 %v3361_v61, %v2064_v37 }
 0x602   : > { %v4568_v19 = vmax.f32 %v2073_v55, 0.0  ;;  %v2236_v20 = vmul.f32 %v4538_v7, %v4552_v50  ;;  %v2268_v23 = vmul.f32 %v4541_v10, %v4552_v50  ;;  %v2220_v25 = vmul.f32 %v4544_v11, %v4552_v50 }
 0x603   : > { %v4576_v42 = vmax.f32 %v2065_v51, 0.0  ;;  %v2234_v4 = vmul.f32 %v4538_v7, %v4560_v27  ;;  %v2266_v8 = vmul.f32 %v4541_v10, %v4560_v27  ;;  %v2218_v26 = vmul.f32 %v4544_v11, %v4560_v27 }
 0x604   : > { %v2250_v28 = vmul.f32 %v4547_v17, %v4560_v27  ;;  %v2237_v29 = vmul.f32 %v4538_v7, %v4568_v19  ;;  %v2269_v30 = vmul.f32 %v4541_v10, %v4568_v19  ;;  %v2221_v31 = vmul.f32 %v4544_v11, %v4568_v19 }
 0x605   : > { %v3651_v32 = vpop.f32.mrb[28].mxu0  ;;  %v2235_v36 = vmul.f32 %v4538_v7, %v4576_v42  ;;  %v2267_v40 = vmul.f32 %v4541_v10, %v4576_v42  ;;  %v2219_v35 = vmul.f32 %v4544_v11, %v4576_v42  ;;  %v2251_v41 = vmul.f32 %v4547_v17, %v4576_v42 }
 0x606   : > { %v2086_v39 = vadd.f32 %v3651_v32, %v3361_v61  ;;  %v2077_v45 = vpop.f32.mrb[29].mxu0  ;;  %v2299_v46 = vpack.c.bf16 %v2237_v29, %v2236_v20  ;;  %v2315_v47 = vpack.c.bf16 %v2269_v30, %v2268_v23  ;;  %v2291_v48 = vpack.c.bf16 %v2221_v31, %v2220_v25 }
 0x607   : > { %v2078_v49 = vadd.f32 %v3361_v61, %v2077_v45  ;;  %v3652_v34 = vpop.f32.mrb[30].mxu0  ;;  %v2298_v43 = vpack.c.bf16 %v2235_v36, %v2234_v4  ;;  %v2314_v54 = vpack.c.bf16 %v2267_v40, %v2266_v8  ;;  %v2290_v13 = vpack.c.bf16 %v2219_v35, %v2218_v26 }
 0x608   : > { %v4600_v15 = vmax.f32 %v2086_v39, 0.0  ;;  %v2089_v9 = vadd.f32 %v3652_v34, %v3361_v61  ;;  %v2080_v58 = vpop.f32.mrb[31].mxu0  ;;  %v2306_v18 = vpack.c.bf16 %v2251_v41, %v2250_v28  ;;  %v2252_v59 = vmul.f32 %v4547_v17, %v4552_v50 }
 0x609   : > { %v4604_v38 = vmax.f32 %v2078_v49, 0.0  ;;  %v2081_v33 = vadd.f32 %v3361_v61, %v2080_v58  ;;  %3520 = vmatprep.subr.bf16.mxu1 %v2298_v43  ;;  %3542 = vmatprep.subr.bf16.mxu0 %v2314_v54  ;;  %v2253_v53 = vmul.f32 %v4547_v17, %v4568_v19  ;;  %v2242_v21 = vmul.f32 %v4555_v56, %v4560_v27 }
 0x60a   : > { %v4610_v60 = vmax.f32 %v2089_v9, 0.0  ;;  %3521 = vmatpush3.bf16.msra.mxu1 %v2290_v13  ;;  %3543 = vmatpush3.bf16.msra.mxu0 %v2306_v18  ;;  %v2240_v44 = vmul.f32 %v4538_v7, %v4600_v15  ;;  %v2272_v62 = vmul.f32 %v4541_v10, %v4600_v15  ;;  %v2224_v61 = vmul.f32 %v4544_v11, %v4600_v15 }
 0x60b   : > { %v4618_v63 = vmax.f32 %v2081_v33, 0.0  ;;  %3522 = vmatprep.subr.bf16.mxu1 %v2299_v46  ;;  %3544 = vmatprep.subr.bf16.mxu0 %v2315_v47  ;;  %v2307_v0 = vpack.c.bf16 %v2253_v53, %v2252_v59  ;;  %v2238_v2 = vmul.f32 %v4538_v7, %v4604_v38  ;;  %v2270_v3 = vmul.f32 %v4541_v10, %v4604_v38 }
 0x60c   : > { %v2222_v5 = vmul.f32 %v4544_v11, %v4604_v38  ;;  %v2254_v12 = vmul.f32 %v4547_v17, %v4604_v38  ;;  %v2241_v16 = vmul.f32 %v4538_v7, %v4610_v60  ;;  %v2273_v55 = vmul.f32 %v4541_v10, %v4610_v60 }
 0x60d   : > { %v2239_v37 = vmul.f32 %v4538_v7, %v4618_v63  ;;  %v2271_v51 = vmul.f32 %v4541_v10, %v4618_v63  ;;  %v2223_v20 = vmul.f32 %v4544_v11, %v4618_v63  ;;  %v2255_v23 = vmul.f32 %v4547_v17, %v4618_v63 }
 0x60e   : > { %3523 = vmatpush3.bf16.msra.mxu1 %v2291_v48  ;;  %3545 = vmatpush3.bf16.msra.mxu0 %v2307_v0  ;;  %v2301_v25 = vpack.c.bf16 %v2241_v16, %v2240_v44  ;;  %v2317_v4 = vpack.c.bf16 %v2273_v55, %v2272_v62  ;;  %v2225_v8 = vmul.f32 %v4544_v11, %v4610_v60 }
 0x60f   : > { %v2300_v26 = vpack.c.bf16 %v2239_v37, %v2238_v2  ;;  %v2316_v28 = vpack.c.bf16 %v2271_v51, %v2270_v3  ;;  %v2292_v29 = vpack.c.bf16 %v2223_v20, %v2222_v5  ;;  %v2308_v7 = vpack.c.bf16 %v2255_v23, %v2254_v12 }
 0x610   : > { %v2293_v30 = vpack.c.bf16 %v2225_v8, %v2224_v61  ;;  %v2256_v10 = vmul.f32 %v4547_v17, %v4600_v15  ;;  %v2257_v31 = vmul.f32 %v4547_v17, %v4610_v60  ;;  %v2243_v32 = vmul.f32 %v4555_v56, %v4576_v42 }
 0x611   : > { %3524 = vmatprep.subr.bf16.mxu1 %v2300_v26  ;;  %3546 = vmatprep.subr.bf16.mxu0 %v2316_v28  ;;  %v2274_v36 = vmul.f32 %v4563_v1, %v4560_v27  ;;  %v2275_v11 = vmul.f32 %v4563_v1, %v4576_v42  ;;  %v2226_v40 = vmul.f32 %v4550_v52, %v4560_v27 }
 0x612   : > { %3525 = vmatpush3.bf16.msra.mxu1 %v2292_v29  ;;  %3547 = vmatpush3.bf16.msra.mxu0 %v2308_v7  ;;  %v2309_v35 = vpack.c.bf16 %v2257_v31, %v2256_v10  ;;  %v2302_v41 = vpack.c.bf16 %v2243_v32, %v2242_v21  ;;  %v2227_v17 = vmul.f32 %v4550_v52, %v4576_v42 }
 0x613   : > { %3526 = vmatprep.subr.bf16.mxu1 %v2301_v25  ;;  %3548 = vmatprep.subr.bf16.mxu0 %v2317_v4  ;;  %v2318_v39 = vpack.c.bf16 %v2275_v11, %v2274_v36  ;;  %v2258_v45 = vmul.f32 %v4558_v57, %v4560_v27  ;;  %v2259_v46 = vmul.f32 %v4558_v57, %v4576_v42 }
 0x614   : > { %v2294_v47 = vpack.c.bf16 %v2227_v17, %v2226_v40  ;;  %v2244_v48 = vmul.f32 %v4555_v56, %v4552_v50  ;;  %v2245_v49 = vmul.f32 %v4555_v56, %v4568_v19  ;;  %v2276_v34 = vmul.f32 %v4563_v1, %v4552_v50  ;;  %v3368_v17 = vld [vmem:[%s4934_s28] ss:$0 sm:$0xff]  ;;  %s4936_s28 = sld [smem:[#allocation16_spill]] }
 0x615   : > { %v2310_v43 = vpack.c.bf16 %v2259_v46, %v2258_v45  ;;  %v2277_v54 = vmul.f32 %v4563_v1, %v4568_v19  ;;  %v2228_v13 = vmul.f32 %v4550_v52, %v4552_v50  ;;  %v2229_v9 = vmul.f32 %v4550_v52, %v4568_v19 }
 0x616   : > { %3527 = vmatpush3.bf16.msra.mxu1 %v2293_v30  ;;  %3549 = vmatpush3.bf16.msra.mxu0 %v2309_v35  ;;  %v2303_v58 = vpack.c.bf16 %v2245_v49, %v2244_v48  ;;  %v2260_v18 = vmul.f32 %v4558_v57, %v4552_v50  ;;  %v2261_v59 = vmul.f32 %v4558_v57, %v4568_v19  ;;  %v3843_v35 = vld [vmem:[%s4000_s13] ss:$20 sps:$4 sm:$0xff]  }
 0x617   : > { %3528 = vmatprep.subr.bf16.mxu1 %v2302_v41  ;;  %3550 = vmatprep.subr.bf16.mxu0 %v2318_v39  ;;  %v2319_v33 = vpack.c.bf16 %v2277_v54, %v2276_v34  ;;  %v2295_v53 = vpack.c.bf16 %v2229_v9, %v2228_v13  ;;  %v2246_v21 = vmul.f32 %v4555_v56, %v4604_v38  ;;  %v3846_v41 = vld [vmem:[%s4000_s13 + $0x8] ss:$20 sps:$4 sm:$0xff]  }
 0x618   : > { %v2311_v44 = vpack.c.bf16 %v2261_v59, %v2260_v18  ;;  %v2247_v62 = vmul.f32 %v4555_v56, %v4618_v63  ;;  %v2278_v61 = vmul.f32 %v4563_v1, %v4604_v38  ;;  %v2279_v0 = vmul.f32 %v4563_v1, %v4618_v63 }
 0x619   : > { %v2230_v2 = vmul.f32 %v4550_v52, %v4604_v38  ;;  %v2231_v3 = vmul.f32 %v4550_v52, %v4618_v63  ;;  %v2262_v5 = vmul.f32 %v4558_v57, %v4604_v38  ;;  %v2263_v12 = vmul.f32 %v4558_v57, %v4618_v63 }
 0x61a   : > { %3529 = vmatpush3.bf16.msra.mxu1 %v2294_v47  ;;  %3551 = vmatpush3.bf16.msra.mxu0 %v2310_v43  ;;  %v2304_v16 = vpack.c.bf16 %v2247_v62, %v2246_v21  ;;  %v2320_v55 = vpack.c.bf16 %v2279_v0, %v2278_v61  ;;  %v2248_v37 = vmul.f32 %v4555_v56, %v4600_v15 }
 0x61b   : > { %3530 = vmatprep.subr.bf16.mxu1 %v2303_v58  ;;  %3552 = vmatprep.subr.bf16.mxu0 %v2319_v33  ;;  %v2296_v51 = vpack.c.bf16 %v2231_v3, %v2230_v2  ;;  %v2312_v20 = vpack.c.bf16 %v2263_v12, %v2262_v5  ;;  %v2249_v23 = vmul.f32 %v4555_v56, %v4610_v60  ;;  %v3852_v5 = vld [vmem:[%s4935_s11] sm:$0xff]   ;;  %v3853_v12 = vld [vmem:[%s4935_s11 + $0x8] ss:$0 sps:$4 sm:$0xff]  }
 0x61c   : > { %v2280_v25 = vmul.f32 %v4563_v1, %v4600_v15  ;;  %v2281_v4 = vmul.f32 %v4563_v1, %v4610_v60  ;;  %v2232_v8 = vmul.f32 %v4550_v52, %v4600_v15  ;;  %v2233_v26 = vmul.f32 %v4550_v52, %v4610_v60 }
 0x61d   : > { %v2305_v28 = vpack.c.bf16 %v2249_v23, %v2248_v37  ;;  %v2264_v29 = vmul.f32 %v4558_v57, %v4600_v15  ;;  %v2265_v7 = vmul.f32 %v4558_v57, %v4610_v60  ;;  %v2282_v56 = vmul.f32 %v4566_v6, %v4560_v27 }
 0x61e   : > { %3531 = vmatpush3.bf16.msra.mxu1 %v2295_v53  ;;  %3553 = vmatpush3.bf16.msra.mxu0 %v2311_v44  ;;  %v2321_v30 = vpack.c.bf16 %v2281_v4, %v2280_v25  ;;  %v2297_v1 = vpack.c.bf16 %v2233_v26, %v2232_v8  ;;  %v2283_v10 = vmul.f32 %v4566_v6, %v4576_v42  ;;  %v3980_v26 = vmov 0  }
 0x61f   : > { %3532 = vmatprep.subr.bf16.mxu1 %v2304_v16  ;;  %3554 = vmatprep.subr.bf16.mxu0 %v2320_v55  ;;  %v2313_v52 = vpack.c.bf16 %v2265_v7, %v2264_v29  ;;  %v2284_v31 = vmul.f32 %v4566_v6, %v4552_v50  ;;  %v2285_v57 = vmul.f32 %v4566_v6, %v4568_v19  ;;  %v2580_v16 = vsel %vm2578_vm6, %v3853_v12, 0  ;;  %v3375_v55 = vld [vmem:[%s4936_s28] ss:$0 sm:$0xff]  ;;  %s4939_s28 = sld [smem:[#allocation18_spill]] }
 0x620   : > { %v2322_v32 = vpack.c.bf16 %v2283_v10, %v2282_v56  ;;  %v2286_v27 = vmul.f32 %v4566_v6, %v4604_v38  ;;  %v2287_v36 = vmul.f32 %v4566_v6, %v4618_v63  ;;  %v2288_v42 = vmul.f32 %v4566_v6, %v4600_v15  ;;  %v3850_v15 = vld [vmem:[%s4933_s23] sm:$0xff]   ;;  %v3851_v38 = vld [vmem:[%s4933_s23 + $0x8] sm:$0xff]  }
 0x621   : > { %v2323_v11 = vpack.c.bf16 %v2285_v57, %v2284_v31  ;;  %v2289_v40 = vmul.f32 %v4566_v6, %v4610_v60  ;;  %v3849_v6 = vld [vmem:[%s4000_s13 + $0x10] ss:$20 sps:$4 sm:$0xff]  }
 0x622   : > { %3533 = vmatpush3.bf16.msra.mxu1 %v2296_v51  ;;  %3555 = vmatpush3.bf16.msra.mxu0 %v2312_v20  ;;  %v2324_v50 = vpack.c.bf16 %v2287_v36, %v2286_v27  ;;  %v2627_v29 = vld [vmem:[%s4938_s3] sm:$0xff]  ;;  %v3383_v36 = vld.sshfl [vmem:[%s4938_s3 + $0x8] sm:$0x1 pattern:$0x75316420]  ;;  %s4941_s3 = sld [smem:[#allocation20_spill]] }
 0x623   : > { %3534 = vmatprep.subr.bf16.mxu1 %v2305_v28  ;;  %3556 = vmatprep.subr.bf16.mxu0 %v2321_v30  ;;  %v2325_v19 = vpack.c.bf16 %v2289_v40, %v2288_v42  ;;  %v3855_v28 = vld [vmem:[%s4937_s1 + $0x4] ss:$8 sps:$4 sm:$0xff]   ;;  %v2631_v7 = vcombine.high %v2627_v29, %v2627_v29  ;;  %v2638_v56 = vrot.slane %v2627_v29, %v4222_v14 }
 0x625   : > { %v2645_v30 = vrot.slane %v2631_v7, %v4222_v14 }
 0x626   : > { %3535 = vmatpush3.bf16.msra.mxu1 %v2297_v1  ;;  %3557 = vmatpush3.bf16.msra.mxu0 %v2313_v52  ;;  %v2646_v1 = vcombine.high %v2638_v56, %v2638_v56  ;;  %v2654_v52 = vrot.slane %v2638_v56, %v4222_v14  ;;  %v3857_v56 = vld [vmem:[%s4937_s1] ss:$8 sps:$4 sm:$0xff]   ;;  %s4942_s1 = sld [smem:[#allocation23_spill]] }
 0x627   : > { %3653 = vmatprep.subr.bf16.mxu1 %v3978_v22  ;;  %3665 = vmatprep.subr.bf16.mxu0 %v3978_v22  ;;  %v2647_v10 = vcombine.high %v2645_v30, %v2645_v30  ;;  %v2661_v57 = vrot.slane %v2645_v30, %v4222_v14 }
 0x628   : > { %v2668_v31 = vrot.slane %v2646_v1, %v4222_v14  ;;  %v2676_v27 = vcombine.high %v2654_v52, %v2654_v52 }
 0x629   : > { %2394 = vmatmul.mubr.bf16.vlgmr.msra.gmra.mrb[40].mxu1 %v3843_v35  ;;  %2435 = vmatmul.mubr.bf16.vlgmr.msra.gmra.mrb[32].mxu0 %v3846_v41  ;;  %v2677_v40 = vcombine.high %v2661_v57, %v2661_v57  ;;  %v2693_v35 = vrot.slane %v3383_v36, %v4222_v14 }
 0x62a   : > { %3654 = vmatpush3.bf16.msra.mxu1 %v2322_v32  ;;  %3661 = vmatprep.mubr.msk.bf16.mxu1 %vm3979_vm2, %v3978_v22  ;;  %v2675_v32 = vrot.slane %v2647_v10, %v4222_v14  ;;  %v2678_v42 = vcombine.high %v2668_v31, %v2668_v31 }
 0x62b   : > { %3655 = vmatprep.subr.bf16.mxu1 %v3978_v22  ;;  %3669 = vmatprep.mubr.msk.bf16.mxu0 %vm3979_vm2, %v3978_v22 }
 0x62c   : > { %3666 = vmatpush3.bf16.msra.mxu0 %v3850_v15  ;;  %v2697_v15 = vrot.slane %v2654_v52, %v4232_v24 }
 0x62d   : > { %3667 = vmatprep.subr.bf16.mxu0 %v3978_v22 }
 0x62e   : > { %3656 = vmatpush3.bf16.msra.mxu1 %v2323_v11  ;;  %v3379_v11 = vld [vmem:[%s4939_s28] ss:$0 sm:$0xff]  ;;  %s4940_s28 = sld [smem:[#allocation21_spill]] }
 0x62f   : > { %3657 = vmatprep.subr.bf16.mxu1 %v3978_v22 }
 0x630   : > { %3668 = vmatpush3.bf16.msra.mxu0 %v3851_v38  ;;  %v2701_v38 = vrot.slane %v2668_v31, %v4232_v24 }
 0x631   : > { %3673 = vmatprep.subr.bf16.mxu0 %v3978_v22 }
 0x632   : > { %3658 = vmatpush3.bf16.msra.mxu1 %v2324_v50 }
 0x633   : > { %3659 = vmatprep.subr.bf16.mxu1 %v3978_v22 }
 0x634   : > { %v3858_v30 = vld [vmem:[%s4940_s28] sm:$0xff]   ;;  %v3859_v1 = vld [vmem:[%s4940_s28 + $0x8] sm:$0xff]   ;;  %v3860_v10 = vld [vmem:[%s4940_s28 + $0x10] sm:$0xff]  }
 0x636   : > { %3660 = vmatpush3.bf16.msra.mxu1 %v2325_v19  ;;  %v2679_v19 = vcombine.high %v2675_v32, %v2675_v32 }
 0x637   : > { %2785 = vmatprep.subr.bf16.mxu1 %v3980_v26 }
 0x639   : > { %3662 = vmatmul.mubr.msk.bf16.vlgmr.msra.gmra.mrb[44].mxu1 %vm1529_vm1, %v3849_v6 }
 0x63a   : > { %3387 = vmatprep.mubr.msk.bf16.mxu1 %vm1745_vm3, %v3855_v28 }
 0x6fc   : > { %v3536_v60 = vpop.f32.mrb[40].mxu1  ;;  %v3558_v63 = vpop.f32.mrb[32].mxu0 }
 0x6fd   : > { %v3537_v39 = vpop.f32.mrb[41].mxu1  ;;  %v3559_v45 = vpop.f32.mrb[33].mxu0 }
 0x6fe   : > { %v3538_v46 = vadd.f32 %v3537_v39, %v3536_v60  ;;  %v3539_v47 = vpop.f32.mrb[42].mxu1  ;;  %v3560_v48 = vadd.f32 %v3559_v45, %v3558_v63  ;;  %v3561_v49 = vpop.f32.mrb[34].mxu0  ;;  %v2705_v60 = vrot.slane %v2676_v27, %v4232_v24  ;;  %v2713_v39 = vrot.slane %v2661_v57, %v4232_v24 }
 0x6ff   : > { %v3540_v34 = vpop.f32.mrb[43].mxu1  ;;  %v3562_v43 = vpop.f32.mrb[35].mxu0  ;;  %v2717_v45 = vrot.slane %v2675_v32, %v4232_v24 }
 0x700   : > { %v2396_v54 = vadd.f32 %v3538_v46, %v3368_v17  ;;  %v3541_v13 = vadd.f32 %v3540_v34, %v3539_v47  ;;  %v3563_v9 = vadd.f32 %v3562_v43, %v3561_v49  ;;  %v2721_v46 = vrot.slane %v2677_v40, %v4232_v24 }
 0x701   : > { %v2725_v49 = vrot.slane %v2679_v19, %v4232_v24  ;;  %v2729_v34 = vrot.slane %v2693_v35, %v4232_v24 }
 0x702   : > { %v2399_v58 = vadd.f32 %v3541_v13, %v3368_v17  ;;  %v2437_v18 = vadd.f32 %v3560_v48, %v2396_v54  ;;  %v2709_v17 = vrot.slane %v2678_v42, %v4232_v24 }
 0x704   : > { %v2440_v59 = vadd.f32 %v3563_v9, %v2399_v58 }
 0x70c   : > { %v2477_v33 = vpop.f32.mrb[44].mxu1 }
 0x70d   : > { %v2478_v53 = vadd.f32 %v2477_v33, %v2437_v18  ;;  %v3663_v21 = vpop.f32.mrb[45].mxu1 }
 0x70e   : > { %v2480_v44 = vpop.f32.mrb[46].mxu1 }
 0x70f   : > { %v2481_v62 = vadd.f32 %v2480_v44, %v2440_v59  ;;  %v3664_v61 = vpop.f32.mrb[47].mxu1  ;;  %v2484_v0 = vmax.f32 %v2478_v53, 0.0 }
 0x711   : > { %v2485_v2 = vmax.f32 %v2481_v62, 0.0 }
 0x713   : > { %v2486_v3 = vpack.c.bf16 %v2485_v2, %v2484_v0 }
 0x715   : > { %3670 = vmatmul.mubr.msk.bf16.vlgmr.msra.gmra.mrb[36].mxu0 %vm1092_vm0, %v2486_v3 }
 0x716   : > { %3677 = vmatprep.mubr.msk.bf16.mxu0 %vm3979_vm2, %v3978_v22  ;;  %3674 = vmatpush3.bf16.msra.mxu0 %v3852_v5 }
 0x717   : > { %3675 = vmatprep.subr.bf16.mxu0 %v3978_v22 }
 0x71a   : > { %3676 = vmatpush3.bf16.msra.mxu0 %v2580_v16 }
 0x71b   : > { %3681 = vmatprep.subr.bf16.mxu0 %v3978_v22 }
 0x7e8   : > { %v2547_v37 = vpop.f32.mrb[36].mxu0 }
 0x7e9   : > { %v3671_v51 = vpop.f32.mrb[37].mxu0  ;;  %v4751_v23 = vadd.f32 %v3375_v55, %v2547_v37 }
 0x7ea   : > { %v2550_v20 = vpop.f32.mrb[38].mxu0 }
 0x7eb   : > { %v4753_v25 = vadd.f32 %v3375_v55, %v2550_v20  ;;  %v3672_v4 = vpop.f32.mrb[39].mxu0 }
 0x7ed   : > { %v2554_v8 = vpack.c.bf16 %v4753_v25, %v4751_v23 }
 0x7ef   : > { %3678 = vmatmul.mubr.msk.bf16.vlgmr.msra.gmra.mrb[40].mxu0 %vm2574_vm7, %v2554_v8 }
 0x7f0   : > { %3687 = vmatprep.mubr.msk.bf16.mxu0 %vm3979_vm2, %v3978_v22  ;;  %3682 = vmatpush3.bf16.msra.mxu0 %v3858_v30 }
 0x7f1   : > { %3683 = vmatprep.subr.bf16.mxu0 %v3978_v22 }
 0x7f4   : > { %3684 = vmatpush3.bf16.msra.mxu0 %v3859_v1 }
 0x7f5   : > { %3685 = vmatprep.subr.bf16.mxu0 %v3978_v22 }
 0x7f8   : > { %3686 = vmatpush3.bf16.msra.mxu0 %v3860_v10 }
 0x7f9   : > { %3691 = vmatprep.subr.bf16.mxu0 %v3978_v22 }
 0x8c2   : > { %v2616_v50 = vpop.f32.mrb[40].mxu0 }
 0x8c3   : > { %v2617_v41 = vadd.f32 %v3379_v11, %v2616_v50  ;;  %v3679_v6 = vpop.f32.mrb[41].mxu0 }
 0x8c4   : > { %v2619_v63 = vpop.f32.mrb[42].mxu0 }
 0x8c5   : > { %v2623_v47 = vmax.f32 %v2617_v41, 0.0  ;;  %v2620_v48 = vadd.f32 %v3379_v11, %v2619_v63  ;;  %v3680_v14 = vpop.f32.mrb[43].mxu0 }
 0x8c7   : > { %v2624_v43 = vmax.f32 %v2620_v48, 0.0  ;;  %v2739_v54 = vmul.f32 %v2697_v15, %v2623_v47  ;;  %v2741_v13 = vmul.f32 %v2701_v38, %v2623_v47  ;;  %v2743_v9 = vmul.f32 %v2705_v60, %v2623_v47 }
 0x8c8   : > { %v2745_v58 = vmul.f32 %v2709_v17, %v2623_v47  ;;  %v2747_v18 = vmul.f32 %v2713_v39, %v2623_v47  ;;  %v2749_v59 = vmul.f32 %v2717_v45, %v2623_v47  ;;  %v2751_v33 = vmul.f32 %v2721_v46, %v2623_v47 }
 0x8c9   : > { %v2740_v53 = vmul.f32 %v2697_v15, %v2624_v43  ;;  %v2742_v21 = vmul.f32 %v2701_v38, %v2624_v43  ;;  %v2744_v44 = vmul.f32 %v2705_v60, %v2624_v43  ;;  %v2746_v62 = vmul.f32 %v2709_v17, %v2624_v43 }
 0x8ca   : > { %v2748_v61 = vmul.f32 %v2713_v39, %v2624_v43  ;;  %v2750_v0 = vmul.f32 %v2717_v45, %v2624_v43  ;;  %v2752_v2 = vmul.f32 %v2721_v46, %v2624_v43  ;;  %v2753_v3 = vmul.f32 %v2725_v49, %v2623_v47  ;;  %v3861_v39 = vld [vmem:[%s4942_s1] sm:$0x3f]   ;;  %s1033_s1 = sand.u32 1, %s3933_s16  }
 0x8cb   : > { %v2757_v5 = vpack.c.bf16 %v2740_v53, %v2739_v54  ;;  %v2758_v12 = vpack.c.bf16 %v2742_v21, %v2741_v13  ;;  %v2759_v16 = vpack.c.bf16 %v2744_v44, %v2743_v9  ;;  %v2760_v55 = vpack.c.bf16 %v2746_v62, %v2745_v58  ;;  %v2847_v46 = vld [vmem:[%s4943_s5] sm:$0x1]  ;;  %s4946_s5 = sld [smem:[#allocation27_spill]]  ;;  %s3207_s9 = scalar_lea.sflag [#allocation3], %s1033_s1 }
 0x8cc   : > { %v2761_v37 = vpack.c.bf16 %v2748_v61, %v2747_v18  ;;  %v2762_v51 = vpack.c.bf16 %v2750_v0, %v2749_v59  ;;  %v2763_v20 = vpack.c.bf16 %v2752_v2, %v2751_v33  ;;  %v2754_v4 = vmul.f32 %v2725_v49, %v2624_v43  ;;  %v2913_v18 = vld [vmem:[%s4945_s6] sm:$0x1]  ;;  %s4947_s6 = sld [smem:[#allocation26_spill]] }
 0x8cd   : > { %2786 = vmatpush1.bf16.msra.mxu1 %v2757_v5  ;;  %v2755_v8 = vmul.f32 %v2729_v34, %v2623_v47  ;;  %v2756_v28 = vmul.f32 %v2729_v34, %v2624_v43  ;;  %v2925_v45 = vsel %vm2923_vm9, %v3861_v39, 0 }
 0x8ce   : > { %2787 = vmatprep.subr.bf16.mxu1 %v3980_v26  ;;  %v2764_v29 = vpack.c.bf16 %v2754_v4, %v2753_v3 }
 0x8cf   : > { %v2765_v7 = vpack.c.bf16 %v2756_v28, %v2755_v8 }
 0x8d1   : > { %2788 = vmatpush1.bf16.msra.mxu1 %v2758_v12 }
 0x8d2   : > { %2789 = vmatprep.subr.bf16.mxu1 %v3980_v26  ;;  %v3395_v4 = vld [vmem:[%s4947_s6] ss:$0 sm:$0xff]  ;;  %s3408_s6 = sshll.u32 %s4183_s0, 4  ;;  %s3981_s0 = smov [#allocation2]  }
 0x8d3   : > { %s4845_s8 = scalar_lea.hbm %s4160_s17, %s3408_s6 }
 0x8d5   : > { %2790 = vmatpush1.bf16.msra.mxu1 %v2759_v16 }
 0x8d6   : > { %2791 = vmatprep.subr.bf16.mxu1 %v3980_v26 }
 0x8d9   : > { %2792 = vmatpush1.bf16.msra.mxu1 %v2760_v55  ;;  %v3865_v55 = vld [vmem:[%s4946_s5] sm:$0xff]  }
 0x8da   : > { %2793 = vmatprep.subr.bf16.mxu1 %v3980_v26 }
 0x8dd   : > { %2794 = vmatpush1.bf16.msra.mxu1 %v2761_v37  ;;  %v3866_v37 = vld [vmem:[%s4946_s5 + $0x8] ss:$0 sps:$4 sm:$0xff]  }
 0x8de   : > { %2795 = vmatprep.subr.bf16.mxu1 %v3980_v26 }
 0x8e1   : > { %2796 = vmatpush1.bf16.msra.mxu1 %v2762_v51  ;;  %v3085_v51 = vsel %vm2578_vm6, %v3866_v37, 0 }
 0x8e2   : > { %2797 = vmatprep.subr.bf16.mxu1 %v3980_v26 }
 0x8e5   : > { %2798 = vmatpush1.bf16.msra.mxu1 %v2763_v20  ;;  %v3867_v20 = vld [vmem:[%s4150_s27] sm:$0xff]  }
 0x8e6   : > { %2799 = vmatprep.subr.bf16.mxu1 %v3980_v26 }
 0x8e9   : > { %2800 = vmatpush1.bf16.msra.mxu1 %v2764_v29 }
 0x8ea   : > { %2801 = vmatprep.subr.bf16.mxu1 %v3980_v26  ;;  %v3384_v26 = vld [vmem:[%s4941_s3] ss:$0 sm:$0xff]  ;;  %s4944_s3 = sld [smem:[#allocation25_spill]] }
 0x8ed   : > { %2802 = vmatpush1.bf16.msra.mxu1 %v2765_v7 }
 0x8ee   : > { %3707 = vmatprep.subr.bf16.mxu1 %v3978_v22 }
 0x8f0   : > { %2818 = vmatmul.mubr.bf16.vlgmr.msra.gmra.mrb[48].mxu1 %v3857_v56  ;;  %v3862_v13 = vld [vmem:[%s4944_s3] sm:$0xff]   ;;  %v3863_v9 = vld [vmem:[%s4944_s3 + $0x8] sm:$0xff]   ;;  %v3864_v58 = vld [vmem:[%s4944_s3 + $0x10] sm:$0xff]   ;;  %s1034_s3 = scalar_lea.vmem [#allocation2], %s1033_s1 }
 0x8f1   : > { %3711 = vmatprep.mubr.msk.bf16.mxu1 %vm3979_vm2, %v3978_v22  ;;  %3708 = vmatpush3.bf16.msra.mxu1 %v3865_v55  ;;  %s3219_s5 = sshll.u32 %s1034_s3, 4  ;;  %s4847_s5 = int_to_ptr.vmem [resolvable:$true] %s3219_s5 }
 0x8f2   : > { %3709 = vmatprep.subr.bf16.mxu1 %v3978_v22  ;;  %s3879_s11 = scalar_lea.vmem %s4847_s5, 16 }
 0x8f3   : > { %p3880_p11 = scmp.ne.s32.totalorder %s4847_s5, %s3879_s11 }
 0x8f5   : > { %3710 = vmatpush3.bf16.msra.mxu1 %v3085_v51  ;;  %p3881_p12 = pnand %p3880_p11, %p4200_p5 }
 0x8f7   : > { %p3882_p13 = pneg %p3881_p12 }
 0x9c3   : > { %v2819_v52 = vpop.f32.mrb[48].mxu1 }
 0x9c4   : > { %v2820_v31 = vadd.f32 %v3384_v26, %v2819_v52  ;;  %v2821_v57 = vpop.f32.mrb[49].mxu1 }
 0x9c5   : > { %v2822_v32 = vpop.f32.mrb[50].mxu1 }
 0x9c6   : > { %v2826_v27 = vmax.f32 %v2820_v31, 0.0  ;;  %v2823_v36 = vadd.f32 %v3384_v26, %v2822_v32  ;;  %v2824_v11 = vpop.f32.mrb[51].mxu1 }
 0x9c8   : > { %v2827_v42 = vmax.f32 %v2823_v36, 0.0  ;;  %v2829_v40 = vsel %vm2828_vm8, %v2826_v27, 0.0 }
 0x9ca   : > { %v2830_v50 = vsel %vm2828_vm8, %v2827_v42, 0.0 }
 0x9cb   : > { %v2831_v19 = vadd.f32 %v2830_v50, %v2829_v40  ;;  %v3869_v50 = vld [vmem:[%s4150_s27 + $0x10] sm:$0xff]  }
 0x9cd   : > { %v2832_v35 = vrot.slane %v2831_v19, 4 }
 0x9cf   : > { %v2833_v41 = vadd.f32 %v2832_v35, %v2831_v19  ;;  %v3071_v19 = vld [vmem:[%s4145_s20] sm:$0x1] }
 0x9d1   : > { %v2834_v6 = vrot.slane %v2833_v41, 2 }
 0x9d3   : > { %v2835_v15 = vadd.f32 %v2834_v6, %v2833_v41 }
 0x9d5   : > { %v2836_v38 = vrot.slane %v2835_v15, 1 }
 0x9d7   : > { %v2837_v60 = vadd.f32 %v2836_v38, %v2835_v15 }
 0x9d9   : > { %v2839_v63 = vmul.f32 0.0625, %v2837_v60 }
 0x9db   : > { %v2840_v17 = vpack.c.bf16 %v2839_v63, %v2839_v63 }
 0x9dd   : > { %3688 = vmatmul.mubr.msk.bf16.vlgmr.msra.gmra.mrb[44].mxu0 %vm2828_vm8, %v2840_v17  ;;  %v3137_v17 = vld [vmem:[%s4948_s4] sm:$0x1]  ;;  %s3883_s4 = sshll.u32 %s3981_s0, 4  ;;  %s3884_s4 = int_to_ptr.vmem [resolvable:$false] %s3883_s4 }
 0x9de   : > { %3693 = vmatprep.mubr.msk.bf16.mxu0 %vm3979_vm2, %v3978_v22  ;;  %3692 = vmatpush3.bf16.msra.mxu0 %v2925_v45  ;;  %s3885_s12 = scalar_lea.vmem %s3884_s4, 32  ;;  %p3886_p0 = scmp.lt.s32.totalorder %s4847_s5, %s3884_s4 }
 0x9df   : > { %3697 = vmatprep.subr.bf16.mxu0 %v3978_v22  ;;  %p3887_p1 = scmp.lt.s32.totalorder %s3885_s12, %s3879_s11 }
 0x9e1   : > { %p3888_p2 = por %p3887_p1, %p3886_p0 }
 0x9e3   : > { %p3889_p3 = pnand %p3888_p2, %p3882_p13 }
 0xab0   : > { %v2903_v47 = vpop.f32.mrb[44].mxu0 }
 0xab1   : > { %v2904_v48 = vadd.f32 %v2903_v47, %v2847_v46  ;;  %v3689_v14 = vpop.f32.mrb[45].mxu0 }
 0xab2   : > { %v2906_v49 = vpop.f32.mrb[46].mxu0 }
 0xab3   : > { %v2909_v34 = vmax.f32 %v2904_v48, 0.0  ;;  %v3690_v43 = vpop.f32.mrb[47].mxu0 }
 0xab5   : > { %v2910_v54 = vpack.c.bf16 %v2909_v34, %v2909_v34 }
 0xab7   : > { %3694 = vmatmul.mubr.msk.bf16.vlgmr.msra.gmra.mrb[48].mxu0 %vm2919_vm10, %v2910_v54 }
 0xab8   : > { %3703 = vmatprep.mubr.msk.bf16.mxu0 %vm3979_vm2, %v3978_v22  ;;  %3698 = vmatpush3.bf16.msra.mxu0 %v3862_v13 }
 0xab9   : > { %3699 = vmatprep.subr.bf16.mxu0 %v3978_v22 }
 0xabc   : > { %3700 = vmatpush3.bf16.msra.mxu0 %v3863_v9 }
 0xabd   : > { %3701 = vmatprep.subr.bf16.mxu0 %v3978_v22 }
 0xac0   : > { %3702 = vmatpush3.bf16.msra.mxu0 %v3864_v58 }
 0xac1   : > { %3715 = vmatprep.subr.bf16.mxu0 %v3978_v22 }
 0xb8a   : > { %v2961_v59 = vpop.f32.mrb[48].mxu0 }
 0xb8b   : > { %v2962_v33 = vadd.f32 %v2961_v59, %v2913_v18  ;;  %v3695_v53 = vpop.f32.mrb[49].mxu0 }
 0xb8c   : > { %v2964_v21 = vpop.f32.mrb[50].mxu0 }
 0xb8d   : > { %v3394_v44 = vmul.f32 -1.442695, %v2962_v33  ;;  %v3696_v62 = vpop.f32.mrb[51].mxu0 }
 0xb8f   : > { %3875 = vpow2.f32 %v3394_v44 }
 0xb99   : > { %v3876_v61 = vpop.eup %3875 }
 0xb9a   : > { %v2970_v0 = vadd.f32 1.0, %v3876_v61 }
 0xb9c   : > { %3877 = vrcp.f32 %v2970_v0 }
 0xba6   : > { %v3878_v2 = vpop.eup %3877 }
 0xba7   : > { %v2976_v3 = vrot.slane %v3878_v2, %v4232_v24  ;;  %v3868_v24 = vld [vmem:[%s4150_s27 + $0x8] sm:$0xff]  }
 0xba9   : > { %v2977_v5 = vmul.f32 %v2976_v3, %v2826_v27  ;;  %v2978_v12 = vmul.f32 %v2976_v3, %v2827_v42 }
 0xbab   : > { %v2979_v16 = vpack.c.bf16 %v2978_v12, %v2977_v5 }
 0xbad   : > { %3704 = vmatmul.mubr.msk.bf16.vlgmr.msra.gmra.mrb[52].mxu0 %vm2828_vm8, %v2979_v16 }
 0xbae   : > { %3723 = vmatprep.mubr.msk.bf16.mxu0 %vm3979_vm2, %v3978_v22  ;;  %3716 = vmatpush3.bf16.msra.mxu0 %v3867_v20 }
 0xbaf   : > { %3717 = vmatprep.subr.bf16.mxu0 %v3978_v22 }
 0xbb2   : > { %3718 = vmatpush3.bf16.msra.mxu0 %v3868_v24 }
 0xbb3   : > { %3719 = vmatprep.subr.bf16.mxu0 %v3978_v22 }
 0xbb6   : > { %3720 = vmatpush3.bf16.msra.mxu0 %v3869_v50 }
 0xbb7   : > { %3721 = vmatprep.subr.bf16.mxu0 %v3978_v22 }
 0xc80   : > { %v3048_v8 = vpop.f32.mrb[52].mxu0 }
 0xc81   : > { %v3049_v28 = vadd.f32 %v3395_v4, %v3048_v8  ;;  %v3705_v29 = vpop.f32.mrb[53].mxu0 }
 0xc82   : > { %v3051_v7 = vpop.f32.mrb[54].mxu0 }
 0xc83   : > { %v3055_v56 = vadd.f32 %v3049_v28, %v4751_v23  ;;  %v3052_v30 = vadd.f32 %v3395_v4, %v3051_v7  ;;  %v3706_v1 = vpop.f32.mrb[55].mxu0 }
 0xc85   : > { %v3056_v10 = vadd.f32 %v3052_v30, %v4753_v25  ;;  %v3057_v26 = vsel %vm2574_vm7, %v3055_v56, 0.0  ;;  %v3870_v25 = vld [vmem:[%s4150_s27 + $0x18] sm:$0xff]  }
 0xc86   : > { %3722 = vmatpush3.bf16.msra.mxu0 %v3870_v25 }
 0xc87   : > { %v3058_v52 = vsel %vm2574_vm7, %v3056_v10, 0.0 }
 0xc88   : > { %v3059_v31 = vadd.f32 %v3058_v52, %v3057_v26 }
 0xc8a   : > { %v3060_v57 = vrot.slane %v3059_v31, 4 }
 0xc8c   : > { %v3061_v32 = vadd.f32 %v3060_v57, %v3059_v31 }
 0xc8e   : > { %v3062_v27 = vrot.slane %v3061_v32, 2 }
 0xc90   : > { %v3063_v36 = vadd.f32 %v3062_v27, %v3061_v32 }
 0xc92   : > { %v3064_v11 = vrot.slane %v3063_v36, 1 }
 0xc94   : > { %v3065_v42 = vadd.f32 %v3064_v11, %v3063_v36 }
 0xc96   : > { %v3066_v40 = vmul.f32 0.0625, %v3065_v42 }
 0xc98   : > { %v3067_v23 = vpack.c.bf16 %v3066_v40, %v3066_v40 }
 0xc9a   : > { %3712 = vmatmul.mubr.msk.bf16.vlgmr.msra.gmra.mrb[52].mxu1 %vm2574_vm7, %v3067_v23 }
 0xd6d   : > { %v3121_v35 = vpop.f32.mrb[52].mxu1 }
 0xd6e   : > { %v3122_v41 = vadd.f32 %v3121_v35, %v3071_v19  ;;  %v3713_v6 = vpop.f32.mrb[53].mxu1 }
 0xd6f   : > { %v3124_v15 = vpop.f32.mrb[54].mxu1 }
 0xd70   : > { %v3127_v38 = vmax.f32 %v3122_v41, 0.0  ;;  %v3714_v60 = vpop.f32.mrb[55].mxu1 }
 0xd72   : > { %v3128_v63 = vpack.c.bf16 %v3127_v38, %v3127_v38 }
 0xd74   : > { %3724 = vmatmul.mubr.msk.bf16.vlgmr.msra.gmra.mrb[56].mxu0 %vm1529_vm1, %v3128_v63 }
 0xe47   : > { %v3199_v39 = vpop.f32.mrb[56].mxu0 }
 0xe48   : > { %v3200_v22 = vadd.f32 %v3199_v39, %v3137_v17  ;;  %v3725_v45 = vpop.f32.mrb[57].mxu0 }
 0xe49   : > { %v3202_v46 = vpop.f32.mrb[58].mxu0 }
 0xe4a   : > { %3205 = vst [vmem:[%s1034_s3] sm:$0x1] %v3200_v22  ;;  %v3726_v47 = vpop.f32.mrb[59].mxu0 }
 0xe4b   : > { %3892 = shalt.err (!%p3889_p3)
}
 0xe4c   : > { %s3893_s3 = scalar_lea.hbm %s4845_s8, 16  ;;  %s3897_s1 = scalar_lea.hbm %s4160_s17, 32 }
 0xe4d   : > { %p3894_p4 = scmp.ne.s32.totalorder %s4845_s8, %s3893_s3  ;;  %p3898_p9 = scmp.lt.u32.totalorder %s4845_s8, %s4160_s17 }
 0xe4e   : > { %p3899_p10 = scmp.lt.u32.totalorder %s3897_s1, %s3893_s3  ;;  %p3901_p12 = scmp.lt.u32.totalorder %s3893_s3, %s4845_s8 }
 0xe4f   : > { %p3895_p7 = pnand %p3894_p4, %p4200_p5 }
 0xe50   : > { %p3900_p11 = por %p3899_p10, %p3898_p9 }
 0xe51   : > { %p3896_p8 = pneg %p3895_p7 }
 0xe52   : > { %p3902_p0 = por %p3901_p12, %p3900_p11 }
 0xe54   : > { %p3903_p13 = pnand %p3902_p0, %p3896_p8 }
 0xe56   : > { %3906 = shalt.err (!%p3903_p13)
}
 0xe57   : > { %3727 = dma.vmem_to_hbm [thread:$0]  (%p4200_p5), %s4847_s5, 16, %s4845_s8, %s3207_s9  }
 0xe58 PF: > { %p3733_p1 = scmp.ge.s32.totalorder %s3941_s22, 2  ;;  %s3231_s12 = sand.u32 1, %s3929_s15  }
 0xe59   : > { %s3232_s4 = scalar_lea.sflag [#allocation3], %s3231_s12 }
 0xe5a   : > { %p3730_p2 = pnand %p3733_p1, %p4204_p6 }
 0xe5c   : > { %3924 = dma.done.wait (!%p3730_p2), %s3232_s4, 16  }
 0xe5d   : > { %3926 = vsyncadd (!%p3730_p2), %s3232_s4, 4294967280  ;;  %p79_p3 = scmp.ge.s32.totalorder %s4187_s26, 4   ;;  %s4949_s15 = smov %s3933_s16 }
 0xe5e   : > { %s4950_s16 = smov %s3937_s18  ;;  %s4951_s18 = smov %s4198_s2 }
 0xe5f   : > { %s4952_s22 = smov %s4187_s26  ;;  %81 = sbr.rel (!%p79_p3) target bundleno = 73 (0x49), region = 225 }
 0xe66   :  { %3236 = vsyncpa [#allocation3], 1 }
 0xe67   :  { %3238 = vsyncpa [#allocation3 + $0x1], 1 }

</bundles_post_ra>
